<compile_context>
chip_gen: v7x
topology: tpu7x:2x2x1
jax: 0.10.0
libtpu: 0.0.40
codegen_flags: <defaults>
</compile_context>

<pallas_src>
import functools

import jax
import jax.numpy as jnp
from jax.experimental import pallas as pl
from jax.experimental.pallas import tpu as pltpu


HIDDEN = 512
LANE = 128
MXU_ROWS = 256  # full MXU row group on v6e / v7x


def _round_up(n, m):
    return ((n + m - 1) // m) * m


def _cdiv(a, b):
    return (a + b - 1) // b


def _default_epilogue_dtype():
    """bf16 bias/ReLU epilogue on chips with a bf16 VPU (v6e/v7x); f32 on
    older generations (v5e and earlier have no bf16 VALU)."""
    try:
        kind = jax.devices()[0].device_kind.lower()
    except Exception:
        kind = ""
    for old in ("v2", "v3", "v4", "v5"):
        if old in kind:
            return jnp.float32
    return jnp.bfloat16


def _dqn_kernel(x_ref,
                w1_ref, b1_ref,
                w2_ref, b2_ref,
                w3_ref, b3_ref,
                w4_ref, b4_ref,
                o_ref):
    """Fused MLP forward for one batch tile; all operands live in VMEM.

    Matmuls run on the MXU with bf16 inputs and f32 accumulation
    (preferred_element_type=f32).  The bias-add + ReLU epilogue runs on the
    VPU in the bias dtype (bf16 on v6e/v7x, f32 on v5e).
    """
    h = x_ref[...].astype(jnp.bfloat16)

    for w_ref, b_ref in ((w1_ref, b1_ref), (w2_ref, b2_ref), (w3_ref, b3_ref)):
        acc = jnp.dot(h, w_ref[...], preferred_element_type=jnp.float32)
        act = acc.astype(b_ref.dtype) + b_ref[...]
        h = jnp.maximum(act, 0.0).astype(jnp.bfloat16)

    out = jnp.dot(h, w4_ref[...], preferred_element_type=jnp.float32)
    out = out + b4_ref[...].astype(jnp.float32)
    o_ref[...] = out.astype(o_ref.dtype)


def prepare_params(params, *, epilogue_dtype=None):
    """One-time conversion of f32 (in, out)-layout params into kernel layout.

    * w1..w4 -> bf16 (MXU-native).
    * b1..b3 -> epilogue dtype (bf16 on v6e/v7x, f32 on v5e); b4 stays f32
      because the final Q-values are produced in f32.
    * The last layer's weight/bias are zero-padded on the output (lane) axis
      to a multiple of 128 so the kernel writes a lane-dense output block.
    """
    if epilogue_dtype is None:
        epilogue_dtype = _default_epilogue_dtype()

    kp = {}
    for i in (1, 2, 3):
        kp[f"w{i}"] = params[f"w{i}"].astype(jnp.bfloat16)
        kp[f"b{i}"] = params[f"b{i}"].astype(epilogue_dtype)

    w4 = params["w4"]
    b4 = params["b4"]
    n = w4.shape[1]
    n_pad = _round_up(n, LANE)
    if n_pad != n:
        w4 = jnp.pad(w4, ((0, 0), (0, n_pad - n)))
        b4 = jnp.pad(b4, ((0, 0), (0, n_pad - n)))
    kp["w4"] = w4.astype(jnp.bfloat16)
    kp["b4"] = b4.astype(jnp.float32)
    return kp


def _choose_batch_tile(B, batch_tile):
    """MXU-aligned batch tile. Multiples of 256 for large B, round_up(B, 8)
    for small B, and >= 2 grid steps when B >= 512 so v7x can shard across
    both TensorCores."""
    bt_req = max(MXU_ROWS, _round_up(batch_tile, MXU_ROWS))
    if B <= bt_req:
        bt = max(8, _round_up(B, 8))      # single tile, no wasted rows
    else:
        bt = bt_req
    if B >= 2 * MXU_ROWS:
        bt = min(bt, _round_up(_cdiv(B, 2), MXU_ROWS))
        bt = max(bt, MXU_ROWS)
    return bt


@functools.partial(jax.jit,
                   static_argnames=("action_size", "batch_tile", "slice_output"))
def dqn_forward(x, kparams, *, action_size, batch_tile=512, slice_output=True):
    """Runs the fused DQN forward pass with Pallas.

    x        : (B, state_size) float32
    kparams  : output of prepare_params (bf16 weights; bf16/f32 biases; w4/b4
               padded to a 128-lane multiple on the action axis)
    """
    w1, b1 = kparams["w1"], kparams["b1"]
    w2, b2 = kparams["w2"], kparams["b2"]
    w3, b3 = kparams["w3"], kparams["b3"]
    w4, b4 = kparams["w4"], kparams["b4"]

    B, state_size = x.shape
    n_pad = w4.shape[1]

    bt = _choose_batch_tile(B, batch_tile)
    grid = (pl.cdiv(B, bt),)

    # Weights / biases: same full-array block at every grid step (DMA'd once).
    # Their index_map is constant, so single-buffer them -- double-buffering
    # would only double their VMEM footprint.
    def rep(arr):
        return pl.BlockSpec(arr.shape, lambda i: (0, 0),
                            pipeline_mode=pl.Buffered(1))

    out = pl.pallas_call(
        _dqn_kernel,
        out_shape=jax.ShapeDtypeStruct((B, n_pad), jnp.float32),
        grid_spec=pltpu.PrefetchScalarGridSpec(
            num_scalar_prefetch=0,
            grid=grid,
            in_specs=[
                pl.BlockSpec((bt, state_size), lambda i: (i, 0)),  # x tile
                rep(w1), rep(b1),
                rep(w2), rep(b2),
                rep(w3), rep(b3),
                rep(w4), rep(b4),
            ],
            out_specs=pl.BlockSpec((bt, n_pad), lambda i: (i, 0)),
        ),
        compiler_params=pltpu.CompilerParams(
            dimension_semantics=("parallel",),
            vmem_limit_bytes=32 * 1024 * 1024,
        ),
    )(x, w1, b1, w2, b2, w3, b3, w4, b4)

    if slice_output:
        # Large-batch consumers that can accept the 128-lane padded block (or
        # fuse e.g. an argmax over the first action_size columns) should pass
        # slice_output=False to avoid this extra HBM pass.
        out = out[:, :action_size]
    return out


def init_dqn_params(key, state_size, action_size):
    """Deterministic init matching nn.Linear's default U(-1/sqrt(fan_in), +)."""
    sizes = [(state_size, HIDDEN), (HIDDEN, HIDDEN), (HIDDEN, HIDDEN),
             (HIDDEN, action_size)]
    params = {}
    keys = jax.random.split(key, 2 * len(sizes))
    for idx, (fan_in, fan_out) in enumerate(sizes):
        bound = 1.0 / jnp.sqrt(jnp.float32(fan_in))
        w = jax.random.uniform(keys[2 * idx], (fan_in, fan_out),
                               minval=-bound, maxval=bound, dtype=jnp.float32)
        b = jax.random.uniform(keys[2 * idx + 1], (1, fan_out),
                               minval=-bound, maxval=bound, dtype=jnp.float32)
        params[f"w{idx + 1}"] = w
        params[f"b{idx + 1}"] = b
    return params


def dqn_reference_f32(x, params):
    """Pure-JAX f32 reference of the original module's forward pass."""
    h = jnp.maximum(x @ params["w1"] + params["b1"], 0.0)
    h = jnp.maximum(h @ params["w2"] + params["b2"], 0.0)
    h = jnp.maximum(h @ params["w3"] + params["b3"], 0.0)
    return h @ params["w4"] + params["b4"]


def dqn_reference_kernel_math(x, kparams, action_size):
    """Pure-JAX reference using the exact same dtype chain as the kernel
    (bf16 MXU inputs, f32 accumulation, epilogue in the stored bias dtype)."""
    h = x.astype(jnp.bfloat16)
    for i in (1, 2, 3):
        acc = jnp.dot(h, kparams[f"w{i}"], preferred_element_type=jnp.float32)
        act = acc.astype(kparams[f"b{i}"].dtype) + kparams[f"b{i}"]
        h = jnp.maximum(act, 0.0).astype(jnp.bfloat16)
    out = jnp.dot(h, kparams["w4"], preferred_element_type=jnp.float32)
    out = out + kparams["b4"].astype(jnp.float32)
    return out[:, :action_size]


if __name__ == "__main__":
    key = jax.random.PRNGKey(0)
    k_param, k_x = jax.random.split(key)

    batch = 2
    state_size = 8
    action_size = 4

    params = init_dqn_params(k_param, state_size, action_size)
    kparams = prepare_params(params)
    x = jax.random.normal(k_x, (batch, state_size), dtype=jnp.float32)

    out = dqn_forward(x, kparams, action_size=action_size)
    out = jax.block_until_ready(out)

    assert out.shape == (batch, action_size), out.shape

    # Tight check against a reference with identical bf16/f32 dtype chain.
    ref_k = dqn_reference_kernel_math(x, kparams, action_size)
    err_k = jnp.max(jnp.abs(out - ref_k))
    assert jnp.allclose(out, ref_k, atol=2e-2, rtol=2e-2), (
        f"max abs err vs kernel-math reference: {err_k}")

    # Loose sanity check against the original full-f32 forward pass.
    ref_f32 = dqn_reference_f32(x, params)
    err_f32 = jnp.max(jnp.abs(out - ref_f32))
    assert jnp.allclose(out, ref_f32, atol=1.5e-1, rtol=1e-1), (
        f"max abs err vs f32 reference: {err_f32}")

    print("KERNEL_OK")
</pallas_src>

<mosaic_0001>
module attributes {stable_mosaic.version = 11 : i64} {
  func.func @_dqn_kernel(%arg0: i32, %arg1: memref<8x8xf32, #tpu.memory_space<vmem>>, %arg2: memref<8x512xbf16, #tpu.memory_space<vmem>>, %arg3: memref<1x512xbf16, #tpu.memory_space<vmem>>, %arg4: memref<512x512xbf16, #tpu.memory_space<vmem>>, %arg5: memref<1x512xbf16, #tpu.memory_space<vmem>>, %arg6: memref<512x512xbf16, #tpu.memory_space<vmem>>, %arg7: memref<1x512xbf16, #tpu.memory_space<vmem>>, %arg8: memref<512x128xbf16, #tpu.memory_space<vmem>>, %arg9: memref<1x128xf32, #tpu.memory_space<vmem>>, %arg10: memref<8x128xf32, #tpu.memory_space<vmem>>) attributes {dimension_semantics = [#tpu.dimension_semantics<parallel>], iteration_bounds = array<i64: 1>, scalar_prefetch = 0 : i64, scratch_operands = 0 : i64, tpu.core_type = #tpu.core_type<tc>, window_params = [{transform_indices = @transform_0, window_bounds = array<i64: 8, 8>}, {pipeline_mode = #tpu.pipeline_mode<synchronous>, transform_indices = @transform_1, window_bounds = array<i64: 8, 512>}, {pipeline_mode = #tpu.pipeline_mode<synchronous>, transform_indices = @transform_2, window_bounds = array<i64: 1, 512>}, {pipeline_mode = #tpu.pipeline_mode<synchronous>, transform_indices = @transform_3, window_bounds = array<i64: 512, 512>}, {pipeline_mode = #tpu.pipeline_mode<synchronous>, transform_indices = @transform_4, window_bounds = array<i64: 1, 512>}, {pipeline_mode = #tpu.pipeline_mode<synchronous>, transform_indices = @transform_5, window_bounds = array<i64: 512, 512>}, {pipeline_mode = #tpu.pipeline_mode<synchronous>, transform_indices = @transform_6, window_bounds = array<i64: 1, 512>}, {pipeline_mode = #tpu.pipeline_mode<synchronous>, transform_indices = @transform_7, window_bounds = array<i64: 512, 128>}, {pipeline_mode = #tpu.pipeline_mode<synchronous>, transform_indices = @transform_8, window_bounds = array<i64: 1, 128>}, {transform_indices = @transform_9, window_bounds = array<i64: 8, 128>}]} {
    %c0 = arith.constant 0 : index
    %c0_0 = arith.constant 0 : index
    %0 = vector.load %arg1[%c0, %c0_0] : memref<8x8xf32, #tpu.memory_space<vmem>>, vector<8x8xf32>
    %1 = arith.truncf %0 : vector<8x8xf32> to vector<8x8xbf16>
    %c0_1 = arith.constant 0 : index
    %c0_2 = arith.constant 0 : index
    %2 = vector.load %arg2[%c0_1, %c0_2] : memref<8x512xbf16, #tpu.memory_space<vmem>>, vector<8x512xbf16>
    %cst = arith.constant dense<0.000000e+00> : vector<8x512xf32>
    %3 = tpu.matmul %1, %2, %cst {dimension_numbers = #tpu.dot_dimension_numbers<[1], [0], [0], [1], [0, 0, 1, 1], [], []>} : vector<8x8xbf16>, vector<8x512xbf16>, vector<8x512xf32> -> vector<8x512xf32>
    %4 = arith.truncf %3 : vector<8x512xf32> to vector<8x512xbf16>
    %c0_3 = arith.constant 0 : index
    %c0_4 = arith.constant 0 : index
    %5 = vector.load %arg3[%c0_3, %c0_4] : memref<1x512xbf16, #tpu.memory_space<vmem>>, vector<1x512xbf16>
    %6 = vector.broadcast %5 : vector<1x512xbf16> to vector<8x512xbf16>
    %7 = arith.addf %4, %6 : vector<8x512xbf16>
    %cst_5 = arith.constant 0.000000e+00 : bf16
    %8 = vector.broadcast %cst_5 : bf16 to vector<8x512xbf16>
    %9 = arith.maximumf %7, %8 : vector<8x512xbf16>
    %c0_6 = arith.constant 0 : index
    %c0_7 = arith.constant 0 : index
    %10 = vector.load %arg4[%c0_6, %c0_7] : memref<512x512xbf16, #tpu.memory_space<vmem>>, vector<512x512xbf16>
    %cst_8 = arith.constant dense<0.000000e+00> : vector<8x512xf32>
    %11 = tpu.matmul %9, %10, %cst_8 {dimension_numbers = #tpu.dot_dimension_numbers<[1], [0], [0], [1], [0, 0, 1, 1], [], []>} : vector<8x512xbf16>, vector<512x512xbf16>, vector<8x512xf32> -> vector<8x512xf32>
    %12 = arith.truncf %11 : vector<8x512xf32> to vector<8x512xbf16>
    %c0_9 = arith.constant 0 : index
    %c0_10 = arith.constant 0 : index
    %13 = vector.load %arg5[%c0_9, %c0_10] : memref<1x512xbf16, #tpu.memory_space<vmem>>, vector<1x512xbf16>
    %14 = vector.broadcast %13 : vector<1x512xbf16> to vector<8x512xbf16>
    %15 = arith.addf %12, %14 : vector<8x512xbf16>
    %cst_11 = arith.constant 0.000000e+00 : bf16
    %16 = vector.broadcast %cst_11 : bf16 to vector<8x512xbf16>
    %17 = arith.maximumf %15, %16 : vector<8x512xbf16>
    %c0_12 = arith.constant 0 : index
    %c0_13 = arith.constant 0 : index
    %18 = vector.load %arg6[%c0_12, %c0_13] : memref<512x512xbf16, #tpu.memory_space<vmem>>, vector<512x512xbf16>
    %cst_14 = arith.constant dense<0.000000e+00> : vector<8x512xf32>
    %19 = tpu.matmul %17, %18, %cst_14 {dimension_numbers = #tpu.dot_dimension_numbers<[1], [0], [0], [1], [0, 0, 1, 1], [], []>} : vector<8x512xbf16>, vector<512x512xbf16>, vector<8x512xf32> -> vector<8x512xf32>
    %20 = arith.truncf %19 : vector<8x512xf32> to vector<8x512xbf16>
    %c0_15 = arith.constant 0 : index
    %c0_16 = arith.constant 0 : index
    %21 = vector.load %arg7[%c0_15, %c0_16] : memref<1x512xbf16, #tpu.memory_space<vmem>>, vector<1x512xbf16>
    %22 = vector.broadcast %21 : vector<1x512xbf16> to vector<8x512xbf16>
    %23 = arith.addf %20, %22 : vector<8x512xbf16>
    %cst_17 = arith.constant 0.000000e+00 : bf16
    %24 = vector.broadcast %cst_17 : bf16 to vector<8x512xbf16>
    %25 = arith.maximumf %23, %24 : vector<8x512xbf16>
    %c0_18 = arith.constant 0 : index
    %c0_19 = arith.constant 0 : index
    %26 = vector.load %arg8[%c0_18, %c0_19] : memref<512x128xbf16, #tpu.memory_space<vmem>>, vector<512x128xbf16>
    %cst_20 = arith.constant dense<0.000000e+00> : vector<8x128xf32>
    %27 = tpu.matmul %25, %26, %cst_20 {dimension_numbers = #tpu.dot_dimension_numbers<[1], [0], [0], [1], [0, 0, 1, 1], [], []>} : vector<8x512xbf16>, vector<512x128xbf16>, vector<8x128xf32> -> vector<8x128xf32>
    %c0_21 = arith.constant 0 : index
    %c0_22 = arith.constant 0 : index
    %28 = vector.load %arg9[%c0_21, %c0_22] : memref<1x128xf32, #tpu.memory_space<vmem>>, vector<1x128xf32>
    %29 = vector.broadcast %28 : vector<1x128xf32> to vector<8x128xf32>
    %30 = arith.addf %27, %29 : vector<8x128xf32>
    %c0_23 = arith.constant 0 : index
    %c0_24 = arith.constant 0 : index
    %31 = vector.load %arg10[%c0_23, %c0_24] : memref<8x128xf32, #tpu.memory_space<vmem>>, vector<8x128xf32>
    tpu.vector_store %arg10[%c0_23, %c0_24], %30 {strides = array<i32>} : memref<8x128xf32, #tpu.memory_space<vmem>>, vector<8x128xf32>,
    return
  }
  func.func @transform_0(%arg0: i32) -> (i32, i32) {
    %c0_i32 = arith.constant 0 : i32
    %c0_i32_0 = arith.constant 0 : i32
    return %arg0, %c0_i32 : i32, i32
  }
  func.func @transform_1(%arg0: i32) -> (i32, i32) {
    %c0_i32 = arith.constant 0 : i32
    %c0_i32_0 = arith.constant 0 : i32
    %c0_i32_1 = arith.constant 0 : i32
    return %c0_i32, %c0_i32_0 : i32, i32
  }
  func.func @transform_2(%arg0: i32) -> (i32, i32) {
    %c0_i32 = arith.constant 0 : i32
    %c0_i32_0 = arith.constant 0 : i32
    %c0_i32_1 = arith.constant 0 : i32
    return %c0_i32, %c0_i32_0 : i32, i32
  }
  func.func @transform_3(%arg0: i32) -> (i32, i32) {
    %c0_i32 = arith.constant 0 : i32
    %c0_i32_0 = arith.constant 0 : i32
    %c0_i32_1 = arith.constant 0 : i32
    return %c0_i32, %c0_i32_0 : i32, i32
  }
  func.func @transform_4(%arg0: i32) -> (i32, i32) {
    %c0_i32 = arith.constant 0 : i32
    %c0_i32_0 = arith.constant 0 : i32
    %c0_i32_1 = arith.constant 0 : i32
    return %c0_i32, %c0_i32_0 : i32, i32
  }
  func.func @transform_5(%arg0: i32) -> (i32, i32) {
    %c0_i32 = arith.constant 0 : i32
    %c0_i32_0 = arith.constant 0 : i32
    %c0_i32_1 = arith.constant 0 : i32
    return %c0_i32, %c0_i32_0 : i32, i32
  }
  func.func @transform_6(%arg0: i32) -> (i32, i32) {
    %c0_i32 = arith.constant 0 : i32
    %c0_i32_0 = arith.constant 0 : i32
    %c0_i32_1 = arith.constant 0 : i32
    return %c0_i32, %c0_i32_0 : i32, i32
  }
  func.func @transform_7(%arg0: i32) -> (i32, i32) {
    %c0_i32 = arith.constant 0 : i32
    %c0_i32_0 = arith.constant 0 : i32
    %c0_i32_1 = arith.constant 0 : i32
    return %c0_i32, %c0_i32_0 : i32, i32
  }
  func.func @transform_8(%arg0: i32) -> (i32, i32) {
    %c0_i32 = arith.constant 0 : i32
    %c0_i32_0 = arith.constant 0 : i32
    %c0_i32_1 = arith.constant 0 : i32
    return %c0_i32, %c0_i32_0 : i32, i32
  }
  func.func @transform_9(%arg0: i32) -> (i32, i32) {
    %c0_i32 = arith.constant 0 : i32
    %c0_i32_0 = arith.constant 0 : i32
    return %arg0, %c0_i32 : i32, i32
  }
}

</mosaic_0001>

<bundles_post_ra>
// kernel: dqn_forward.1
= control target key start
LH: loop header
LB: loop body
LE: loop exit
PB: predicated region body
PF: predicated region fallthrough
CT: control target
= control target key end

     0   :  { %14 = vsyncpa [#allocation3], 0  ;;  %s3885_s0 = inlined_call_operand.hbm [shape: f32[2,8], index: 0, kind: input, shape index: {}]   ;;  %s3886_s1 = inlined_call_operand.vmem [shape: bf16[8,512], index: 1, kind: input, shape index: {}]   ;;  %s3887_s2 = inlined_call_operand.hbm [shape: bf16[1,512], index: 2, kind: input, shape index: {}]   ;;  %s3888_s3 = inlined_call_operand.hbm [shape: bf16[512,512], index: 3, kind: input, shape index: {}]   ;;  %s3889_s4 = inlined_call_operand.hbm [shape: bf16[1,512], index: 4, kind: input, shape index: {}]   ;;  %s3890_s5 = inlined_call_operand.hbm [shape: bf16[512,512], index: 5, kind: input, shape index: {}]   ;;  %s3891_s6 = inlined_call_operand.hbm [shape: bf16[1,512], index: 6, kind: input, shape index: {}]   ;;  %s3892_s7 = inlined_call_operand.hbm [shape: bf16[512,128], index: 7, kind: input, shape index: {}]   ;;  %s3893_s8 = inlined_call_operand.vmem [shape: f32[1,128], index: 8, kind: input, shape index: {}]   ;;  %s3894_s9 = inlined_call_operand.hbm [shape: f32[2,128], index: 9, kind: output, shape index: {}]  }
   0x1   :  { %15 = vsyncpa [#allocation6], 0 }
   0x2   :  { %16 = vsyncpa [#allocation9], 0 }
   0x3   :  { %17 = vsyncpa [#allocation12], 0 }
   0x4   :  { %18 = vsyncpa [#allocation4], 0 }
   0x5   :  { %23 = vsyncadd [#allocation3], 96  ;;  %s3644_s30 = smov [#allocation5]   ;;  %s3645_s11 = smov [#allocation8]  }
   0x6   :  { %s39_s10 = sshll.u32 %s3644_s30, 4  ;;  %s61_s12 = sshll.u32 %s3645_s11, 4  ;;  %s40_s10 = int_to_ptr.vmem [resolvable:$true] %s39_s10  ;;  %s62_s12 = int_to_ptr.vmem [resolvable:$true] %s61_s12 }
   0x7   :  { %s3458_s15 = scalar_lea.hbm %s3887_s2, 64 }
   0x8   :  { %p3459_p0 = scmp.ne.s32.totalorder %s3887_s2, %s3458_s15  ;;  %p3462_p1 = scmp.lt.u32.totalorder %s3458_s15, %s3887_s2 }
   0xa   :  { %p3464_p2 = pnand %p3462_p1, %p3459_p0 }
   0xc   :  { %3467 = shalt.err (!%p3464_p2)
}
   0xd   :  { %s3468_s20 = scalar_lea.vmem %s40_s10, 64  ;;  %p3473_p4 = scmp.lt.s32.totalorder %s40_s10, %s40_s10 }
   0xe   :  { %p3469_p3 = scmp.ne.s32.totalorder %s40_s10, %s3468_s20  ;;  %p3474_p5 = scmp.lt.s32.totalorder %s3468_s20, %s3468_s20 }
  0x10   :  { %p3475_p6 = por %p3474_p5, %p3473_p4 }
  0x12   :  { %p3476_p7 = pnand %p3475_p6, %p3469_p3 }
  0x14   :  { %3479 = shalt.err (!%p3476_p7)
}
  0x15   :  { %42 = dma.hbm_to_vmem [thread:$0]  %s3887_s2, 64, %s40_s10, [#allocation6]  }
  0x16   :  { %s3480_s25 = scalar_lea.hbm %s3889_s4, 64 }
  0x17   :  { %p3481_p8 = scmp.ne.s32.totalorder %s3889_s4, %s3480_s25  ;;  %p3484_p9 = scmp.lt.u32.totalorder %s3480_s25, %s3889_s4 }
  0x19   :  { %p3486_p10 = pnand %p3484_p9, %p3481_p8 }
  0x1b   :  { %3489 = shalt.err (!%p3486_p10)
}
  0x1c   :  { %s3490_s30 = scalar_lea.vmem %s62_s12, 64  ;;  %p3495_p12 = scmp.lt.s32.totalorder %s62_s12, %s62_s12 }
  0x1d   :  { %p3491_p11 = scmp.ne.s32.totalorder %s62_s12, %s3490_s30  ;;  %p3496_p13 = scmp.lt.s32.totalorder %s3490_s30, %s3490_s30 }
  0x1f   :  { %p3497_p0 = por %p3496_p13, %p3495_p12 }
  0x21   :  { %p3498_p1 = pnand %p3497_p0, %p3491_p11 }
  0x23   :  { %3501 = shalt.err (!%p3498_p1)
}
  0x24   :  { %64 = dma.hbm_to_vmem [thread:$0]  %s3889_s4, 64, %s62_s12, [#allocation9]  }
  0x25   :  { %s3646_s11 = smov [#allocation11]   ;;  %s3647_s14 = smov [#allocation2]  }
  0x26   :  { %s83_s13 = sshll.u32 %s3646_s11, 4  ;;  %s24_s15 = sshll.u32 %s3647_s14, 4  ;;  %s84_s13 = int_to_ptr.vmem [resolvable:$true] %s83_s13  ;;  %s3734_s15 = int_to_ptr.vmem [resolvable:$true] %s24_s15 }
  0x27   :  { %s3502_s18 = scalar_lea.hbm %s3891_s6, 64 }
  0x28   :  { %p3503_p2 = scmp.ne.s32.totalorder %s3891_s6, %s3502_s18  ;;  %p3506_p3 = scmp.lt.u32.totalorder %s3502_s18, %s3891_s6 }
  0x2a   :  { %p3508_p4 = pnand %p3506_p3, %p3503_p2 }
  0x2c   :  { %3511 = shalt.err (!%p3508_p4)
}
  0x2d   :  { %s3512_s4 = scalar_lea.vmem %s84_s13, 64  ;;  %p3517_p6 = scmp.lt.s32.totalorder %s84_s13, %s84_s13 }
  0x2e   :  { %p3513_p5 = scmp.ne.s32.totalorder %s84_s13, %s3512_s4  ;;  %p3518_p7 = scmp.lt.s32.totalorder %s3512_s4, %s3512_s4 }
  0x30   :  { %p3519_p8 = por %p3518_p7, %p3517_p6 }
  0x32   :  { %p3520_p9 = pnand %p3519_p8, %p3513_p5 }
  0x34   :  { %3523 = shalt.err (!%p3520_p9)
}
  0x35   :  { %86 = dma.hbm_to_vmem [thread:$0]  %s3891_s6, 64, %s84_s13, [#allocation12]  }
  0x36   :  { %s3524_s26 = scalar_lea.hbm %s3885_s0, 32 }
  0x37   :  { %p3525_p10 = scmp.ne.s32.totalorder %s3885_s0, %s3524_s26  ;;  %p3528_p11 = scmp.lt.u32.totalorder %s3524_s26, %s3885_s0 }
  0x39   :  { %p3530_p12 = pnand %p3528_p11, %p3525_p10 }
  0x3b   :  { %3533 = shalt.err (!%p3530_p12)
}
  0x3c   :  { %s3534_s2 = scalar_lea.vmem %s3734_s15, 32  ;;  %s3538_s6 = scalar_lea.vmem %s3734_s15, 128 }
  0x3d   :  { %p3535_p13 = scmp.ne.s32.totalorder %s3734_s15, %s3534_s2  ;;  %p3539_p0 = scmp.lt.s32.totalorder %s3734_s15, %s3734_s15 }
  0x3e   :  { %p3540_p1 = scmp.lt.s32.totalorder %s3538_s6, %s3534_s2 }
  0x40   :  { %p3541_p2 = por %p3540_p1, %p3539_p0 }
  0x42   :  { %p3542_p3 = pnand %p3541_p2, %p3535_p13 }
  0x44   :  { %3545 = shalt.err (!%p3542_p3)
}
  0x45   :  { %s3648_s10 = smov 32   ;;  %s3649_s11 = smov 2  }
  0x46   :  { %30 = dma.hbm_to_vmem [thread:$0]  %s3885_s0, 32, %s3734_s15, [#allocation3], %s3648_s10, %s3648_s10, %s3649_s11  }
  0x47   :  { %s3650_s16 = smov [#allocation7]   ;;  %s3546_s20 = scalar_lea.hbm %s3888_s3, 16384 }
  0x48   :  { %s48_s17 = sshll.u32 %s3650_s16, 4  ;;  %p3547_p4 = scmp.ne.s32.totalorder %s3888_s3, %s3546_s20  ;;  %s49_s17 = int_to_ptr.vmem [resolvable:$true] %s48_s17 }
  0x49   :  { %p3550_p5 = scmp.lt.u32.totalorder %s3546_s20, %s3888_s3 }
  0x4b   :  { %p3552_p6 = pnand %p3550_p5, %p3547_p4 }
  0x4d   :  { %3555 = shalt.err (!%p3552_p6)
}
  0x4e   :  { %s3556_s23 = scalar_lea.vmem %s49_s17, 16384  ;;  %p3561_p8 = scmp.lt.s32.totalorder %s49_s17, %s49_s17 }
  0x4f   :  { %p3557_p7 = scmp.ne.s32.totalorder %s49_s17, %s3556_s23  ;;  %p3562_p9 = scmp.lt.s32.totalorder %s3556_s23, %s3556_s23 }
  0x51   :  { %p3563_p10 = por %p3562_p9, %p3561_p8 }
  0x53   :  { %p3564_p11 = pnand %p3563_p10, %p3557_p7 }
  0x55   :  { %3567 = shalt.err (!%p3564_p11)
}
  0x56   :  { %s3651_s0 = smov 256   ;;  %s3652_s15 = smov 16  }
  0x57   :  { %54 = dma.hbm_to_vmem [thread:$0]  %s3888_s3, 16384, %s49_s17, [#allocation6], %s3651_s0, %s3651_s0, %s3652_s15  }
  0x58   :  { %s3653_s26 = smov [#allocation10]   ;;  %s3654_s28 = smov [#allocation13]  }
  0x59   :  { %s70_s27 = sshll.u32 %s3653_s26, 4  ;;  %s92_s29 = sshll.u32 %s3654_s28, 4  ;;  %s71_s27 = int_to_ptr.vmem [resolvable:$true] %s70_s27  ;;  %s93_s29 = int_to_ptr.vmem [resolvable:$true] %s92_s29 }
  0x5a   :  { %s3568_s6 = scalar_lea.hbm %s3890_s5, 16384 }
  0x5b   :  { %p3569_p12 = scmp.ne.s32.totalorder %s3890_s5, %s3568_s6  ;;  %p3572_p13 = scmp.lt.u32.totalorder %s3568_s6, %s3890_s5 }
  0x5d   :  { %p3574_p0 = pnand %p3572_p13, %p3569_p12 }
  0x5f   :  { %3577 = shalt.err (!%p3574_p0)
}
  0x60   :  { %s3578_s3 = scalar_lea.vmem %s71_s27, 16384  ;;  %p3583_p2 = scmp.lt.s32.totalorder %s71_s27, %s71_s27 }
  0x61   :  { %p3579_p1 = scmp.ne.s32.totalorder %s71_s27, %s3578_s3  ;;  %p3584_p3 = scmp.lt.s32.totalorder %s3578_s3, %s3578_s3 }
  0x63   :  { %p3585_p4 = por %p3584_p3, %p3583_p2 }
  0x65   :  { %p3586_p5 = pnand %p3585_p4, %p3579_p1 }
  0x67   :  { %3589 = shalt.err (!%p3586_p5)
}
  0x68   :  { %76 = dma.hbm_to_vmem [thread:$0]  %s3890_s5, 16384, %s71_s27, [#allocation9], %s3651_s0, %s3651_s0, %s3652_s15  }
  0x69   :  { %s3590_s22 = scalar_lea.hbm %s3892_s7, 4096 }
  0x6a   :  { %p3591_p6 = scmp.ne.s32.totalorder %s3892_s7, %s3590_s22  ;;  %p3594_p7 = scmp.lt.u32.totalorder %s3590_s22, %s3892_s7 }
  0x6c   :  { %p3596_p8 = pnand %p3594_p7, %p3591_p6 }
  0x6e   :  { %3599 = shalt.err (!%p3596_p8)
}
  0x6f   :  { %s3600_s25 = scalar_lea.vmem %s93_s29, 4096  ;;  %p3605_p10 = scmp.lt.s32.totalorder %s93_s29, %s93_s29 }
  0x70   :  { %p3601_p9 = scmp.ne.s32.totalorder %s93_s29, %s3600_s25  ;;  %p3606_p11 = scmp.lt.s32.totalorder %s3600_s25, %s3600_s25 }
  0x72   :  { %p3607_p12 = por %p3606_p11, %p3605_p10 }
  0x74   :  { %p3608_p13 = pnand %p3607_p12, %p3601_p9 }
  0x76   :  { %3611 = shalt.err (!%p3608_p13)
}
  0x77   :  { %s3655_s5 = smov 64   ;;  %s3656_s0 = smov 4  }
  0x78   :  { %98 = dma.hbm_to_vmem [thread:$0]  %s3892_s7, 4096, %s93_s29, [#allocation12], %s3655_s5, %s3655_s5, %s3656_s0  }
  0x79   :  { %3634 = dma.done.wait [#allocation3], 128  }
  0x7a   :  { %3635 = vsyncadd [#allocation3], 4294967168 }
  0x7b   :  { %3636 = dma.done.wait [#allocation6], 16448  }
  0x7c   :  { %3637 = vsyncadd [#allocation6], 4294950848 }
  0x7d   :  { %3638 = dma.done.wait [#allocation9], 16448  }
  0x7e   :  { %3639 = vsyncadd [#allocation9], 4294950848 }
  0x7f   :  { %3640 = dma.done.wait [#allocation12], 4160  }
  0x80   :  { %3641 = vsyncadd [#allocation12], 4294963136  ;;  %v3657_v0 = vmov 0   ;;  %v125_v1 = vld [vmem:[%s3886_s1] sm:$0xff]  ;;  %vm141_vm0 = vcmask 1043456   ;;  %v123_v2 = vld [vmem:[#allocation2] sm:$0xff] }
  0x81   :  { %186 = vmatprep.mubr.bf16.mxu0 %v3657_v0  ;;  %227 = vmatprep.mubr.bf16.mxu1 %v3657_v0  ;;  %v126_v3 = vld [vmem:[%s3886_s1 + $0x8] sm:$0xff]  ;;  %v2663_v4 = vcombine.high %v125_v1, %v125_v1  ;;  %v2662_v5 = vcombine.low %v125_v1, %v125_v1  ;;  %v3044_v8 = vld [vmem:[#allocation7 + $0x4] ss:$16 sps:$4 sm:$0xff]   ;;  %v124_v10 = vpack.c.bf16 %v123_v2, %v123_v2  ;;  %vm137_vm1 = vcmask 64512   ;;  %v3045_v14 = vld [vmem:[#allocation7 + $0x8] ss:$16 sps:$4 sm:$0xff]  }
  0x82   :  { %v2665_v6 = vcombine.high %v126_v3, %v126_v3  ;;  %v2664_v7 = vcombine.low %v126_v3, %v126_v3  ;;  %v3047_v11 = vld [vmem:[#allocation7 + $0xc] ss:$16 sps:$4 sm:$0xff]   ;;  %v3042_v13 = vld [vmem:[#allocation7] ss:$16 sps:$4 sm:$0xff]   ;;  %v3050_v15 = vld [vmem:[#allocation7 + $0x24] ss:$16 sps:$4 sm:$0xff]  }
  0x83   :  { %2666 = vmatprep.subr.msk.bf16.mxu0 %vm141_vm0, %v2663_v4  ;;  %v143_v9 = vsel %vm141_vm0, %v2662_v5, 0  ;;  %v3053_v16 = vld [vmem:[#allocation7 + $0x2c] ss:$16 sps:$4 sm:$0xff]   ;;  %v3048_v17 = vld [vmem:[#allocation7 + $0x20] ss:$16 sps:$4 sm:$0xff]  }
  0x84   :  { %2668 = vmatprep.subr.msk.bf16.mxu1 %vm141_vm0, %v2665_v6  ;;  %155 = vmatpush1.bf16.msra.mxu0 %v143_v9  ;;  %v149_v12 = vsel %vm141_vm0, %v2664_v7, 0  ;;  %v3051_v18 = vld [vmem:[#allocation7 + $0x28] ss:$16 sps:$4 sm:$0xff]   ;;  %v3056_v19 = vld [vmem:[#allocation7 + $0x44] ss:$16 sps:$4 sm:$0xff]  }
  0x85   :  { %196 = vmatpush1.bf16.msra.mxu1 %v149_v12  ;;  %1070 = vmatprep.subr.bf16.mxu0 %v3044_v8  ;;  %v3059_v20 = vld [vmem:[#allocation7 + $0x4c] ss:$16 sps:$4 sm:$0xff]   ;;  %v3054_v21 = vld [vmem:[#allocation7 + $0x40] ss:$16 sps:$4 sm:$0xff]   ;;  %v3057_v22 = vld [vmem:[#allocation7 + $0x48] ss:$16 sps:$4 sm:$0xff]  }
  0x86   :  { %1152 = vmatprep.subr.bf16.mxu1 %v3047_v11  ;;  %v3062_v23 = vld [vmem:[#allocation7 + $0x64] ss:$16 sps:$4 sm:$0xff]   ;;  %v3065_v24 = vld [vmem:[#allocation7 + $0x6c] ss:$16 sps:$4 sm:$0xff]   ;;  %v3060_v25 = vld [vmem:[#allocation7 + $0x60] ss:$16 sps:$4 sm:$0xff]  }
  0x87   :  { %2667 = vmatmul.mubr.msk.bf16.vlgmr.msra.gmra.mrb[0].mxu0 %vm137_vm1, %v124_v10  ;;  %v3063_v26 = vld [vmem:[#allocation7 + $0x68] ss:$16 sps:$4 sm:$0xff]   ;;  %v3068_v27 = vld [vmem:[#allocation7 + $0x84] ss:$16 sps:$4 sm:$0xff]   ;;  %v3071_v28 = vld [vmem:[#allocation7 + $0x8c] ss:$16 sps:$4 sm:$0xff]  }
  0x88   :  { %2669 = vmatmul.mubr.msk.bf16.vlgmr.msra.gmra.mrb[0].mxu1 %vm137_vm1, %v124_v10  ;;  %1071 = vmatpush1.bf16.msra.mxu0 %v3042_v13  ;;  %v3066_v29 = vld [vmem:[#allocation7 + $0x80] ss:$16 sps:$4 sm:$0xff]   ;;  %v3069_v30 = vld [vmem:[#allocation7 + $0x88] ss:$16 sps:$4 sm:$0xff]   ;;  %v3074_v31 = vld [vmem:[#allocation7 + $0xa4] ss:$16 sps:$4 sm:$0xff]  }
  0x89   :  { %1153 = vmatpush1.bf16.msra.mxu1 %v3045_v14  ;;  %1072 = vmatprep.subr.bf16.mxu0 %v3050_v15  ;;  %v3077_v32 = vld [vmem:[#allocation7 + $0xac] ss:$16 sps:$4 sm:$0xff]   ;;  %v3072_v33 = vld [vmem:[#allocation7 + $0xa0] ss:$16 sps:$4 sm:$0xff]   ;;  %v3075_v34 = vld [vmem:[#allocation7 + $0xa8] ss:$16 sps:$4 sm:$0xff]  }
  0x8a   :  { %1154 = vmatprep.subr.bf16.mxu1 %v3053_v16  ;;  %v3080_v35 = vld [vmem:[#allocation7 + $0xc4] ss:$16 sps:$4 sm:$0xff]   ;;  %v3083_v36 = vld [vmem:[#allocation7 + $0xcc] ss:$16 sps:$4 sm:$0xff]   ;;  %v3078_v37 = vld [vmem:[#allocation7 + $0xc0] ss:$16 sps:$4 sm:$0xff]   ;;  %v253_v16 = vlaneseq }
  0x8b   :  { %v3081_v38 = vld [vmem:[#allocation7 + $0xc8] ss:$16 sps:$4 sm:$0xff]   ;;  %v3086_v39 = vld [vmem:[#allocation7 + $0xe4] ss:$16 sps:$4 sm:$0xff]   ;;  %v3089_v40 = vld [vmem:[#allocation7 + $0xec] ss:$16 sps:$4 sm:$0xff]  }
  0x8c   :  { %1073 = vmatpush1.bf16.msra.mxu0 %v3048_v17  ;;  %v3084_v41 = vld [vmem:[#allocation7 + $0xe0] ss:$16 sps:$4 sm:$0xff]   ;;  %v3087_v42 = vld [vmem:[#allocation7 + $0xe8] ss:$16 sps:$4 sm:$0xff]   ;;  %v3092_v43 = vld [vmem:[#allocation7 + $0x104] ss:$16 sps:$4 sm:$0xff]  }
  0x8d   :  { %1155 = vmatpush1.bf16.msra.mxu1 %v3051_v18  ;;  %1074 = vmatprep.subr.bf16.mxu0 %v3056_v19  ;;  %v3095_v44 = vld [vmem:[#allocation7 + $0x10c] ss:$16 sps:$4 sm:$0xff]   ;;  %v3090_v45 = vld [vmem:[#allocation7 + $0x100] ss:$16 sps:$4 sm:$0xff]   ;;  %v3093_v46 = vld [vmem:[#allocation7 + $0x108] ss:$16 sps:$4 sm:$0xff]  }
  0x8e   :  { %1156 = vmatprep.subr.bf16.mxu1 %v3059_v20  ;;  %v3098_v47 = vld [vmem:[#allocation7 + $0x124] ss:$16 sps:$4 sm:$0xff]   ;;  %v3096_v48 = vld [vmem:[#allocation7 + $0x120] ss:$16 sps:$4 sm:$0xff]   ;;  %v3101_v49 = vld [vmem:[#allocation7 + $0x12c] ss:$16 sps:$4 sm:$0xff]  }
  0x8f   :  { %v3099_v50 = vld [vmem:[#allocation7 + $0x128] ss:$16 sps:$4 sm:$0xff]   ;;  %v3104_v51 = vld [vmem:[#allocation7 + $0x144] ss:$16 sps:$4 sm:$0xff]   ;;  %v3107_v52 = vld [vmem:[#allocation7 + $0x14c] ss:$16 sps:$4 sm:$0xff]  }
  0x90   :  { %1075 = vmatpush1.bf16.msra.mxu0 %v3054_v21  ;;  %v3102_v53 = vld [vmem:[#allocation7 + $0x140] ss:$16 sps:$4 sm:$0xff]   ;;  %v3105_v54 = vld [vmem:[#allocation7 + $0x148] ss:$16 sps:$4 sm:$0xff]   ;;  %v3110_v55 = vld [vmem:[#allocation7 + $0x164] ss:$16 sps:$4 sm:$0xff]  }
  0x91   :  { %1157 = vmatpush1.bf16.msra.mxu1 %v3057_v22  ;;  %1076 = vmatprep.subr.bf16.mxu0 %v3062_v23  ;;  %v3113_v56 = vld [vmem:[#allocation7 + $0x16c] ss:$16 sps:$4 sm:$0xff]   ;;  %v3108_v57 = vld [vmem:[#allocation7 + $0x160] ss:$16 sps:$4 sm:$0xff]   ;;  %v3111_v58 = vld [vmem:[#allocation7 + $0x168] ss:$16 sps:$4 sm:$0xff]  }
  0x92   :  { %1158 = vmatprep.subr.bf16.mxu1 %v3065_v24  ;;  %v3116_v59 = vld [vmem:[#allocation7 + $0x184] ss:$16 sps:$4 sm:$0xff]   ;;  %v3119_v60 = vld [vmem:[#allocation7 + $0x18c] ss:$16 sps:$4 sm:$0xff]   ;;  %v3114_v61 = vld [vmem:[#allocation7 + $0x180] ss:$16 sps:$4 sm:$0xff]  }
  0x93   :  { %v3117_v62 = vld [vmem:[#allocation7 + $0x188] ss:$16 sps:$4 sm:$0xff]   ;;  %v3122_v63 = vld [vmem:[#allocation7 + $0x1a4] ss:$16 sps:$4 sm:$0xff]   ;;  %v3125_v1 = vld [vmem:[#allocation7 + $0x1ac] ss:$16 sps:$4 sm:$0xff]  }
  0x94   :  { %1077 = vmatpush1.bf16.msra.mxu0 %v3060_v25  ;;  %v3120_v2 = vld [vmem:[#allocation7 + $0x1a0] ss:$16 sps:$4 sm:$0xff]   ;;  %v3123_v3 = vld [vmem:[#allocation7 + $0x1a8] ss:$16 sps:$4 sm:$0xff]   ;;  %v3128_v4 = vld [vmem:[#allocation7 + $0x1c4] ss:$16 sps:$4 sm:$0xff]  }
  0x95   :  { %1159 = vmatpush1.bf16.msra.mxu1 %v3063_v26  ;;  %1078 = vmatprep.subr.bf16.mxu0 %v3068_v27  ;;  %v3131_v5 = vld [vmem:[#allocation7 + $0x1cc] ss:$16 sps:$4 sm:$0xff]   ;;  %v3126_v6 = vld [vmem:[#allocation7 + $0x1c0] ss:$16 sps:$4 sm:$0xff]   ;;  %v3129_v7 = vld [vmem:[#allocation7 + $0x1c8] ss:$16 sps:$4 sm:$0xff]  }
  0x96   :  { %1160 = vmatprep.subr.bf16.mxu1 %v3071_v28  ;;  %v3134_v8 = vld [vmem:[#allocation7 + $0x1e4] ss:$16 sps:$4 sm:$0xff]   ;;  %v3137_v9 = vld [vmem:[#allocation7 + $0x1ec] ss:$16 sps:$4 sm:$0xff]   ;;  %v3132_v10 = vld [vmem:[#allocation7 + $0x1e0] ss:$16 sps:$4 sm:$0xff]  }
  0x97   :  { %v3135_v11 = vld [vmem:[#allocation7 + $0x1e8] ss:$16 sps:$4 sm:$0xff]   ;;  %v3140_v12 = vld [vmem:[#allocation7 + $0x204] ss:$16 sps:$4 sm:$0xff]   ;;  %v3143_v13 = vld [vmem:[#allocation7 + $0x20c] ss:$16 sps:$4 sm:$0xff]  }
  0x98   :  { %1079 = vmatpush1.bf16.msra.mxu0 %v3066_v29  ;;  %v3658_v14 = vmov 1966171168   ;;  %v254_v18 = vshrl.u32 %v253_v16, 7  ;;  %v3188_v16 = vld [vmem:[#allocation7 + $0x304] ss:$16 sps:$4 sm:$0xff]  }
  0x99   :  { %1161 = vmatpush1.bf16.msra.mxu1 %v3069_v30  ;;  %1080 = vmatprep.subr.bf16.mxu0 %v3074_v31  ;;  %v251_v15 = vunpack.c.l.s4 %v3658_v14  ;;  %v2670_v19 = vld.sshfl [vmem:[#allocation5] sm:$0x33 pattern:$0x75316420]  ;;  %v3180_v14 = vld [vmem:[#allocation7 + $0x2e0] ss:$16 sps:$4 sm:$0xff]  }
  0x9a   :  { %1162 = vmatprep.subr.bf16.mxu1 %v3077_v32  ;;  %v249_v21 = vcombine.high %v2670_v19, %v2670_v19  ;;  %v3821_v26 = vsub.s32 0, %v254_v18 }
  0x9b   :  { %v252_v17 = vunpack.c.0.s8 %v251_v15  ;;  %v3183_v15 = vld [vmem:[#allocation7 + $0x2e8] ss:$16 sps:$4 sm:$0xff]  }
  0x9c   :  { %1081 = vmatpush1.bf16.msra.mxu0 %v3072_v33 }
  0x9d   :  { %1163 = vmatpush1.bf16.msra.mxu1 %v3075_v34  ;;  %1082 = vmatprep.subr.bf16.mxu0 %v3080_v35  ;;  %v3813_v20 = vsub.s32 %v252_v17, %v254_v18  ;;  %v3191_v17 = vld [vmem:[#allocation7 + $0x30c] ss:$16 sps:$4 sm:$0xff]   ;;  %v3186_v18 = vld [vmem:[#allocation7 + $0x300] ss:$16 sps:$4 sm:$0xff]  }
  0x9e   :  { %1164 = vmatprep.subr.bf16.mxu1 %v3083_v36 }
  0x9f   :  { %v3816_v22 = vrot.slane %v2670_v19, %v3813_v20  ;;  %v263_v23 = vrot.slane %v249_v21, %v3813_v20  ;;  %v3189_v19 = vld [vmem:[#allocation7 + $0x308] ss:$16 sps:$4 sm:$0xff]   ;;  %v3194_v21 = vld [vmem:[#allocation7 + $0x324] ss:$16 sps:$4 sm:$0xff]  }
  0xa0   :  { %1083 = vmatpush1.bf16.msra.mxu0 %v3078_v37 }
  0xa1   :  { %1165 = vmatpush1.bf16.msra.mxu1 %v3081_v38  ;;  %1084 = vmatprep.subr.bf16.mxu0 %v3086_v39  ;;  %v265_v24 = vcombine.high %v263_v23, %v263_v23  ;;  %v267_v25 = vpack.i.b16 %v3816_v22, %v3816_v22  ;;  %v274_v27 = vpack.i.b16 %v263_v23, %v263_v23  ;;  %v3197_v23 = vld [vmem:[#allocation7 + $0x32c] ss:$16 sps:$4 sm:$0xff]  }
  0xa2   :  { %1166 = vmatprep.subr.bf16.mxu1 %v3089_v40 }
  0xa3   :  { %v288_v28 = vpack.i.b16 %v265_v24, %v265_v24  ;;  %v272_v29 = vrot.slane %v267_v25, %v3821_v26  ;;  %v279_v31 = vrot.slane %v274_v27, %v3821_v26  ;;  %v3192_v24 = vld [vmem:[#allocation7 + $0x320] ss:$16 sps:$4 sm:$0xff]   ;;  %v3195_v25 = vld [vmem:[#allocation7 + $0x328] ss:$16 sps:$4 sm:$0xff]   ;;  %v3200_v27 = vld [vmem:[#allocation7 + $0x344] ss:$16 sps:$4 sm:$0xff]  }
  0xa4   :  { %1085 = vmatpush1.bf16.msra.mxu0 %v3084_v41 }
  0xa5   :  { %1167 = vmatpush1.bf16.msra.mxu1 %v3087_v42  ;;  %1086 = vmatprep.subr.bf16.mxu0 %v3092_v43  ;;  %v293_v35 = vrot.slane %v288_v28, %v3821_v26  ;;  %v3203_v28 = vld [vmem:[#allocation7 + $0x34c] ss:$16 sps:$4 sm:$0xff]  }
  0xa6   :  { %1168 = vmatprep.subr.bf16.mxu1 %v3095_v44 }
  0xa8   :  { %1087 = vmatpush1.bf16.msra.mxu0 %v3090_v45 }
  0xa9   :  { %1169 = vmatpush1.bf16.msra.mxu1 %v3093_v46  ;;  %1088 = vmatprep.subr.bf16.mxu0 %v3098_v47  ;;  %v3138_v47 = vld [vmem:[#allocation7 + $0x200] ss:$16 sps:$4 sm:$0xff]  }
  0xaa   :  { %1170 = vmatprep.subr.bf16.mxu1 %v3101_v49 }
  0xac   :  { %1089 = vmatpush1.bf16.msra.mxu0 %v3096_v48  ;;  %v3141_v48 = vld [vmem:[#allocation7 + $0x208] ss:$16 sps:$4 sm:$0xff]  }
  0xad   :  { %1171 = vmatpush1.bf16.msra.mxu1 %v3099_v50  ;;  %1090 = vmatprep.subr.bf16.mxu0 %v3104_v51  ;;  %v3146_v50 = vld [vmem:[#allocation7 + $0x224] ss:$16 sps:$4 sm:$0xff]   ;;  %v3149_v51 = vld [vmem:[#allocation7 + $0x22c] ss:$16 sps:$4 sm:$0xff]  }
  0xae   :  { %1172 = vmatprep.subr.bf16.mxu1 %v3107_v52 }
  0xb0   :  { %1091 = vmatpush1.bf16.msra.mxu0 %v3102_v53  ;;  %v3144_v53 = vld [vmem:[#allocation7 + $0x220] ss:$16 sps:$4 sm:$0xff]  }
  0xb1   :  { %1173 = vmatpush1.bf16.msra.mxu1 %v3105_v54  ;;  %1092 = vmatprep.subr.bf16.mxu0 %v3110_v55  ;;  %v3147_v54 = vld [vmem:[#allocation7 + $0x228] ss:$16 sps:$4 sm:$0xff]   ;;  %v3152_v55 = vld [vmem:[#allocation7 + $0x244] ss:$16 sps:$4 sm:$0xff]  }
  0xb2   :  { %1174 = vmatprep.subr.bf16.mxu1 %v3113_v56  ;;  %v3155_v56 = vld [vmem:[#allocation7 + $0x24c] ss:$16 sps:$4 sm:$0xff]  }
  0xb4   :  { %1093 = vmatpush1.bf16.msra.mxu0 %v3108_v57  ;;  %v3150_v57 = vld [vmem:[#allocation7 + $0x240] ss:$16 sps:$4 sm:$0xff]  }
  0xb5   :  { %1175 = vmatpush1.bf16.msra.mxu1 %v3111_v58  ;;  %1094 = vmatprep.subr.bf16.mxu0 %v3116_v59  ;;  %v3153_v58 = vld [vmem:[#allocation7 + $0x248] ss:$16 sps:$4 sm:$0xff]   ;;  %v3158_v59 = vld [vmem:[#allocation7 + $0x264] ss:$16 sps:$4 sm:$0xff]  }
  0xb6   :  { %1176 = vmatprep.subr.bf16.mxu1 %v3119_v60  ;;  %v3161_v60 = vld [vmem:[#allocation7 + $0x26c] ss:$16 sps:$4 sm:$0xff]  }
  0xb8   :  { %1095 = vmatpush1.bf16.msra.mxu0 %v3114_v61  ;;  %v3156_v61 = vld [vmem:[#allocation7 + $0x260] ss:$16 sps:$4 sm:$0xff]  }
  0xb9   :  { %1177 = vmatpush1.bf16.msra.mxu1 %v3117_v62  ;;  %1096 = vmatprep.subr.bf16.mxu0 %v3122_v63  ;;  %v3159_v62 = vld [vmem:[#allocation7 + $0x268] ss:$16 sps:$4 sm:$0xff]   ;;  %v3164_v63 = vld [vmem:[#allocation7 + $0x284] ss:$16 sps:$4 sm:$0xff]  }
  0xba   :  { %1178 = vmatprep.subr.bf16.mxu1 %v3125_v1  ;;  %v3167_v1 = vld [vmem:[#allocation7 + $0x28c] ss:$16 sps:$4 sm:$0xff]  }
  0xbc   :  { %1097 = vmatpush1.bf16.msra.mxu0 %v3120_v2  ;;  %v3162_v2 = vld [vmem:[#allocation7 + $0x280] ss:$16 sps:$4 sm:$0xff]  }
  0xbd   :  { %1179 = vmatpush1.bf16.msra.mxu1 %v3123_v3  ;;  %1098 = vmatprep.subr.bf16.mxu0 %v3128_v4  ;;  %v3165_v3 = vld [vmem:[#allocation7 + $0x288] ss:$16 sps:$4 sm:$0xff]   ;;  %v3170_v4 = vld [vmem:[#allocation7 + $0x2a4] ss:$16 sps:$4 sm:$0xff]  }
  0xbe   :  { %1180 = vmatprep.subr.bf16.mxu1 %v3131_v5  ;;  %v3173_v5 = vld [vmem:[#allocation7 + $0x2ac] ss:$16 sps:$4 sm:$0xff]  }
  0xc0   :  { %1099 = vmatpush1.bf16.msra.mxu0 %v3126_v6  ;;  %v3168_v6 = vld [vmem:[#allocation7 + $0x2a0] ss:$16 sps:$4 sm:$0xff]  }
  0xc1   :  { %1181 = vmatpush1.bf16.msra.mxu1 %v3129_v7  ;;  %1100 = vmatprep.subr.bf16.mxu0 %v3134_v8  ;;  %v3171_v7 = vld [vmem:[#allocation7 + $0x2a8] ss:$16 sps:$4 sm:$0xff]   ;;  %v3176_v8 = vld [vmem:[#allocation7 + $0x2c4] ss:$16 sps:$4 sm:$0xff]  }
  0xc2   :  { %1182 = vmatprep.subr.bf16.mxu1 %v3137_v9  ;;  %v3179_v9 = vld [vmem:[#allocation7 + $0x2cc] ss:$16 sps:$4 sm:$0xff]  }
  0xc4   :  { %1101 = vmatpush1.bf16.msra.mxu0 %v3132_v10  ;;  %v3174_v10 = vld [vmem:[#allocation7 + $0x2c0] ss:$16 sps:$4 sm:$0xff]  }
  0xc5   :  { %1183 = vmatpush1.bf16.msra.mxu1 %v3135_v11  ;;  %1111 = vmatprep.subr.bf16.mxu0 %v3140_v12  ;;  %v3177_v11 = vld [vmem:[#allocation7 + $0x2c8] ss:$16 sps:$4 sm:$0xff]   ;;  %v3182_v12 = vld [vmem:[#allocation7 + $0x2e4] ss:$16 sps:$4 sm:$0xff]  }
  0xc6   :  { %1193 = vmatprep.subr.bf16.mxu1 %v3143_v13  ;;  %v3185_v13 = vld [vmem:[#allocation7 + $0x2ec] ss:$16 sps:$4 sm:$0xff]  }
 0x15a   :  { %v188_v30 = vpop.f32.mrb[0].mxu0 }
 0x15b   :  { %v236_v32 = vpack.c.bf16 %v188_v30, %v188_v30  ;;  %v190_v33 = vpop.f32.mrb[1].mxu0  ;;  %v3825_v34 = vpop.f32.mrb[0].mxu1  ;;  %v3201_v30 = vld [vmem:[#allocation7 + $0x348] ss:$16 sps:$4 sm:$0xff]  }
 0x15c   :  { %v237_v36 = vpack.c.bf16 %v190_v33, %v190_v33  ;;  %v192_v37 = vpop.f32.mrb[2].mxu0  ;;  %v231_v38 = vpop.f32.mrb[1].mxu1  ;;  %v3204_v33 = vld [vmem:[#allocation7 + $0x360] ss:$16 sps:$4 sm:$0xff]  }
 0x15d   :  { %v294_v39 = vadd.bf16 %v272_v29, %v236_v32  ;;  %v193_v40 = vpop.f32.mrb[3].mxu0  ;;  %v239_v41 = vpack.c.bf16 %v231_v38, %v231_v38  ;;  %v233_v42 = vpop.f32.mrb[2].mxu1  ;;  %v3198_v29 = vld [vmem:[#allocation7 + $0x340] ss:$16 sps:$4 sm:$0xff]   ;;  %v3209_v32 = vld [vmem:[#allocation7 + $0x36c] ss:$16 sps:$4 sm:$0xff]  }
 0x15e   :  { %v295_v43 = vadd.bf16 %v279_v31, %v237_v36  ;;  %v234_v44 = vpop.f32.mrb[3].mxu1  ;;  %v3206_v31 = vld [vmem:[#allocation7 + $0x364] ss:$16 sps:$4 sm:$0xff]   ;;  %v3215_v37 = vld [vmem:[#allocation7 + $0x38c] ss:$16 sps:$4 sm:$0xff]   ;;  %v264_v40 = vcombine.high %v3816_v22, %v3816_v22 }
 0x15f   :  { %v297_v45 = vadd.bf16 %v293_v35, %v239_v41  ;;  %v298_v49 = vmax.bf16 %v3657_v0, %v294_v39  ;;  %v3207_v35 = vld [vmem:[#allocation7 + $0x368] ss:$16 sps:$4 sm:$0xff]   ;;  %v3212_v36 = vld [vmem:[#allocation7 + $0x384] ss:$16 sps:$4 sm:$0xff]   ;;  %v3210_v38 = vld [vmem:[#allocation7 + $0x380] ss:$16 sps:$4 sm:$0xff]  }
 0x160   :  { %v299_v46 = vmax.bf16 %v3657_v0, %v295_v43  ;;  %v3213_v39 = vld [vmem:[#allocation7 + $0x388] ss:$16 sps:$4 sm:$0xff]   ;;  %v3218_v41 = vld [vmem:[#allocation7 + $0x3a4] ss:$16 sps:$4 sm:$0xff]   ;;  %v3221_v42 = vld [vmem:[#allocation7 + $0x3ac] ss:$16 sps:$4 sm:$0xff]  }
 0x161   :  { %v301_v52 = vmax.bf16 %v3657_v0, %v297_v45  ;;  %v3216_v43 = vld [vmem:[#allocation7 + $0x3a0] ss:$16 sps:$4 sm:$0xff]   ;;  %v3219_v44 = vld [vmem:[#allocation7 + $0x3a8] ss:$16 sps:$4 sm:$0xff]   ;;  %v281_v45 = vpack.i.b16 %v264_v40, %v264_v40  ;;  %v3297_v40 = vld [vmem:[#allocation10 + $0x148] ss:$16 sps:$4 sm:$0xff]  }
 0x162   :  { %1102 = vmatprep.mubr.bf16.mxu0 %v299_v46  ;;  %1184 = vmatprep.mubr.bf16.mxu1 %v299_v46  ;;  %v3224_v46 = vld [vmem:[#allocation7 + $0x3c4] ss:$16 sps:$4 sm:$0xff]  }
 0x163   :  { %1103 = vmatmul.mubr.bf16.vlgmr.msra.gmra.mrb[4].mxu0 %v298_v49  ;;  %1185 = vmatmul.mubr.bf16.vlgmr.msra.gmra.mrb[4].mxu1 %v298_v49  ;;  %v3225_v49 = vld [vmem:[#allocation7 + $0x3c8] ss:$16 sps:$4 sm:$0xff]   ;;  %v286_v22 = vrot.slane %v281_v45, %v3821_v26 }
 0x164   :  { %1112 = vmatpush1.bf16.msra.mxu0 %v3138_v47  ;;  %1194 = vmatpush1.bf16.msra.mxu1 %v3141_v48  ;;  %v3227_v47 = vld [vmem:[#allocation7 + $0x3cc] ss:$16 sps:$4 sm:$0xff]   ;;  %v3222_v48 = vld [vmem:[#allocation7 + $0x3c0] ss:$16 sps:$4 sm:$0xff]   ;;  %v3308_v45 = vld [vmem:[#allocation10 + $0x184] ss:$16 sps:$4 sm:$0xff]  }
 0x165   :  { %1113 = vmatprep.subr.bf16.mxu0 %v3146_v50  ;;  %1195 = vmatprep.subr.bf16.mxu1 %v3149_v51  ;;  %v238_v50 = vpack.c.bf16 %v3825_v34, %v3825_v34  ;;  %v3230_v51 = vld [vmem:[#allocation7 + $0x3e4] ss:$16 sps:$4 sm:$0xff]  }
 0x166   :  { %1143 = vmatprep.mubr.bf16.mxu0 %v301_v52  ;;  %1225 = vmatprep.mubr.bf16.mxu1 %v301_v52  ;;  %v3233_v52 = vld [vmem:[#allocation7 + $0x3ec] ss:$16 sps:$4 sm:$0xff]  }
 0x168   :  { %1114 = vmatpush1.bf16.msra.mxu0 %v3144_v53  ;;  %1196 = vmatpush1.bf16.msra.mxu1 %v3147_v54  ;;  %v3228_v53 = vld [vmem:[#allocation7 + $0x3e0] ss:$16 sps:$4 sm:$0xff]   ;;  %v3231_v54 = vld [vmem:[#allocation7 + $0x3e8] ss:$16 sps:$4 sm:$0xff]  }
 0x169   :  { %1115 = vmatprep.subr.bf16.mxu0 %v3152_v55  ;;  %1197 = vmatprep.subr.bf16.mxu1 %v3155_v56  ;;  %v296_v55 = vadd.bf16 %v286_v22, %v238_v50  ;;  %v3236_v56 = vld [vmem:[#allocation10 + $0x4] ss:$16 sps:$4 sm:$0xff]   ;;  %v3317_v50 = vld [vmem:[#allocation10 + $0x1ac] ss:$16 sps:$4 sm:$0xff]   ;;  %v3312_v22 = vld [vmem:[#allocation10 + $0x1a0] ss:$16 sps:$4 sm:$0xff]  }
 0x16b   :  { %v300_v34 = vmax.bf16 %v3657_v0, %v296_v55  ;;  %v3321_v55 = vld [vmem:[#allocation10 + $0x1c8] ss:$16 sps:$4 sm:$0xff]  }
 0x16c   :  { %1116 = vmatpush1.bf16.msra.mxu0 %v3150_v57  ;;  %1198 = vmatpush1.bf16.msra.mxu1 %v3153_v58  ;;  %v3239_v57 = vld [vmem:[#allocation10 + $0xc] ss:$16 sps:$4 sm:$0xff]   ;;  %v3234_v58 = vld [vmem:[#allocation10] ss:$16 sps:$4 sm:$0xff]  }
 0x16d   :  { %1117 = vmatprep.subr.bf16.mxu0 %v3158_v59  ;;  %1199 = vmatprep.subr.bf16.mxu1 %v3161_v60  ;;  %v3237_v59 = vld [vmem:[#allocation10 + $0x8] ss:$16 sps:$4 sm:$0xff]   ;;  %v3242_v60 = vld [vmem:[#allocation10 + $0x24] ss:$16 sps:$4 sm:$0xff]  }
 0x170   :  { %1118 = vmatpush1.bf16.msra.mxu0 %v3156_v61  ;;  %1200 = vmatpush1.bf16.msra.mxu1 %v3159_v62  ;;  %v3245_v61 = vld [vmem:[#allocation10 + $0x2c] ss:$16 sps:$4 sm:$0xff]   ;;  %v3240_v62 = vld [vmem:[#allocation10 + $0x20] ss:$16 sps:$4 sm:$0xff]  }
 0x171   :  { %1119 = vmatprep.subr.bf16.mxu0 %v3164_v63  ;;  %1201 = vmatprep.subr.bf16.mxu1 %v3167_v1  ;;  %v3243_v63 = vld [vmem:[#allocation10 + $0x28] ss:$16 sps:$4 sm:$0xff]   ;;  %v3248_v1 = vld [vmem:[#allocation10 + $0x44] ss:$16 sps:$4 sm:$0xff]  }
 0x174   :  { %1120 = vmatpush1.bf16.msra.mxu0 %v3162_v2  ;;  %1202 = vmatpush1.bf16.msra.mxu1 %v3165_v3  ;;  %v3251_v2 = vld [vmem:[#allocation10 + $0x4c] ss:$16 sps:$4 sm:$0xff]   ;;  %v3246_v3 = vld [vmem:[#allocation10 + $0x40] ss:$16 sps:$4 sm:$0xff]  }
 0x175   :  { %1121 = vmatprep.subr.bf16.mxu0 %v3170_v4  ;;  %1203 = vmatprep.subr.bf16.mxu1 %v3173_v5  ;;  %v3249_v4 = vld [vmem:[#allocation10 + $0x48] ss:$16 sps:$4 sm:$0xff]   ;;  %v3254_v5 = vld [vmem:[#allocation10 + $0x64] ss:$16 sps:$4 sm:$0xff]  }
 0x178   :  { %1122 = vmatpush1.bf16.msra.mxu0 %v3168_v6  ;;  %1204 = vmatpush1.bf16.msra.mxu1 %v3171_v7  ;;  %v3257_v6 = vld [vmem:[#allocation10 + $0x6c] ss:$16 sps:$4 sm:$0xff]   ;;  %v3252_v7 = vld [vmem:[#allocation10 + $0x60] ss:$16 sps:$4 sm:$0xff]  }
 0x179   :  { %1123 = vmatprep.subr.bf16.mxu0 %v3176_v8  ;;  %1205 = vmatprep.subr.bf16.mxu1 %v3179_v9  ;;  %v3255_v8 = vld [vmem:[#allocation10 + $0x68] ss:$16 sps:$4 sm:$0xff]   ;;  %v3260_v9 = vld [vmem:[#allocation10 + $0x84] ss:$16 sps:$4 sm:$0xff]  }
 0x17c   :  { %1124 = vmatpush1.bf16.msra.mxu0 %v3174_v10  ;;  %1206 = vmatpush1.bf16.msra.mxu1 %v3177_v11  ;;  %v3263_v10 = vld [vmem:[#allocation10 + $0x8c] ss:$16 sps:$4 sm:$0xff]   ;;  %v3258_v11 = vld [vmem:[#allocation10 + $0x80] ss:$16 sps:$4 sm:$0xff]  }
 0x17d   :  { %1125 = vmatprep.subr.bf16.mxu0 %v3182_v12  ;;  %1207 = vmatprep.subr.bf16.mxu1 %v3185_v13  ;;  %v3261_v12 = vld [vmem:[#allocation10 + $0x88] ss:$16 sps:$4 sm:$0xff]   ;;  %v3266_v13 = vld [vmem:[#allocation10 + $0xa4] ss:$16 sps:$4 sm:$0xff]  }
 0x180   :  { %1126 = vmatpush1.bf16.msra.mxu0 %v3180_v14  ;;  %1208 = vmatpush1.bf16.msra.mxu1 %v3183_v15  ;;  %v3269_v14 = vld [vmem:[#allocation10 + $0xac] ss:$16 sps:$4 sm:$0xff]   ;;  %v3264_v15 = vld [vmem:[#allocation10 + $0xa0] ss:$16 sps:$4 sm:$0xff]  }
 0x181   :  { %1127 = vmatprep.subr.bf16.mxu0 %v3188_v16  ;;  %1209 = vmatprep.subr.bf16.mxu1 %v3191_v17  ;;  %v3267_v16 = vld [vmem:[#allocation10 + $0xa8] ss:$16 sps:$4 sm:$0xff]   ;;  %v3272_v17 = vld [vmem:[#allocation10 + $0xc4] ss:$16 sps:$4 sm:$0xff]  }
 0x184   :  { %1128 = vmatpush1.bf16.msra.mxu0 %v3186_v18  ;;  %1210 = vmatpush1.bf16.msra.mxu1 %v3189_v19  ;;  %v3275_v18 = vld [vmem:[#allocation10 + $0xcc] ss:$16 sps:$4 sm:$0xff]   ;;  %v3270_v19 = vld [vmem:[#allocation10 + $0xc0] ss:$16 sps:$4 sm:$0xff]  }
 0x185   :  { %1129 = vmatprep.subr.bf16.mxu0 %v3194_v21  ;;  %1211 = vmatprep.subr.bf16.mxu1 %v3197_v23  ;;  %v3273_v21 = vld [vmem:[#allocation10 + $0xc8] ss:$16 sps:$4 sm:$0xff]   ;;  %v3278_v23 = vld [vmem:[#allocation10 + $0xe4] ss:$16 sps:$4 sm:$0xff]  }
 0x188   :  { %1130 = vmatpush1.bf16.msra.mxu0 %v3192_v24  ;;  %1212 = vmatpush1.bf16.msra.mxu1 %v3195_v25  ;;  %v3281_v24 = vld [vmem:[#allocation10 + $0xec] ss:$16 sps:$4 sm:$0xff]   ;;  %v3276_v25 = vld [vmem:[#allocation10 + $0xe0] ss:$16 sps:$4 sm:$0xff]  }
 0x189   :  { %1131 = vmatprep.subr.bf16.mxu0 %v3200_v27  ;;  %1213 = vmatprep.subr.bf16.mxu1 %v3203_v28  ;;  %v3279_v27 = vld [vmem:[#allocation10 + $0xe8] ss:$16 sps:$4 sm:$0xff]   ;;  %v3284_v28 = vld [vmem:[#allocation10 + $0x104] ss:$16 sps:$4 sm:$0xff]  }
 0x18c   :  { %1132 = vmatpush1.bf16.msra.mxu0 %v3198_v29  ;;  %1214 = vmatpush1.bf16.msra.mxu1 %v3201_v30  ;;  %v3287_v29 = vld [vmem:[#allocation10 + $0x10c] ss:$16 sps:$4 sm:$0xff]   ;;  %v3282_v30 = vld [vmem:[#allocation10 + $0x100] ss:$16 sps:$4 sm:$0xff]  }
 0x18d   :  { %1133 = vmatprep.subr.bf16.mxu0 %v3206_v31  ;;  %1215 = vmatprep.subr.bf16.mxu1 %v3209_v32  ;;  %v3285_v31 = vld [vmem:[#allocation10 + $0x108] ss:$16 sps:$4 sm:$0xff]   ;;  %v3290_v32 = vld [vmem:[#allocation10 + $0x124] ss:$16 sps:$4 sm:$0xff]  }
 0x190   :  { %1134 = vmatpush1.bf16.msra.mxu0 %v3204_v33  ;;  %1216 = vmatpush1.bf16.msra.mxu1 %v3207_v35  ;;  %v3293_v33 = vld [vmem:[#allocation10 + $0x12c] ss:$16 sps:$4 sm:$0xff]   ;;  %v3288_v35 = vld [vmem:[#allocation10 + $0x120] ss:$16 sps:$4 sm:$0xff]  }
 0x191   :  { %1135 = vmatprep.subr.bf16.mxu0 %v3212_v36  ;;  %1217 = vmatprep.subr.bf16.mxu1 %v3215_v37  ;;  %v3291_v36 = vld [vmem:[#allocation10 + $0x128] ss:$16 sps:$4 sm:$0xff]   ;;  %v3296_v37 = vld [vmem:[#allocation10 + $0x144] ss:$16 sps:$4 sm:$0xff]  }
 0x194   :  { %1136 = vmatpush1.bf16.msra.mxu0 %v3210_v38  ;;  %1218 = vmatpush1.bf16.msra.mxu1 %v3213_v39  ;;  %v3299_v38 = vld [vmem:[#allocation10 + $0x14c] ss:$16 sps:$4 sm:$0xff]   ;;  %v3294_v39 = vld [vmem:[#allocation10 + $0x140] ss:$16 sps:$4 sm:$0xff]  }
 0x195   :  { %1137 = vmatprep.subr.bf16.mxu0 %v3218_v41  ;;  %1219 = vmatprep.subr.bf16.mxu1 %v3221_v42  ;;  %v3302_v41 = vld [vmem:[#allocation10 + $0x164] ss:$16 sps:$4 sm:$0xff]   ;;  %v3305_v42 = vld [vmem:[#allocation10 + $0x16c] ss:$16 sps:$4 sm:$0xff]  }
 0x198   :  { %1138 = vmatpush1.bf16.msra.mxu0 %v3216_v43  ;;  %1220 = vmatpush1.bf16.msra.mxu1 %v3219_v44  ;;  %v3300_v43 = vld [vmem:[#allocation10 + $0x160] ss:$16 sps:$4 sm:$0xff]   ;;  %v3303_v44 = vld [vmem:[#allocation10 + $0x168] ss:$16 sps:$4 sm:$0xff]  }
 0x199   :  { %1139 = vmatprep.subr.bf16.mxu0 %v3224_v46  ;;  %1221 = vmatprep.subr.bf16.mxu1 %v3227_v47  ;;  %v3311_v46 = vld [vmem:[#allocation10 + $0x18c] ss:$16 sps:$4 sm:$0xff]   ;;  %v3306_v47 = vld [vmem:[#allocation10 + $0x180] ss:$16 sps:$4 sm:$0xff]  }
 0x19c   :  { %1140 = vmatpush1.bf16.msra.mxu0 %v3222_v48  ;;  %1222 = vmatpush1.bf16.msra.mxu1 %v3225_v49  ;;  %v3309_v48 = vld [vmem:[#allocation10 + $0x188] ss:$16 sps:$4 sm:$0xff]   ;;  %v3314_v49 = vld [vmem:[#allocation10 + $0x1a4] ss:$16 sps:$4 sm:$0xff]  }
 0x19d   :  { %1141 = vmatprep.subr.bf16.mxu0 %v3230_v51  ;;  %1223 = vmatprep.subr.bf16.mxu1 %v3233_v52  ;;  %v3315_v51 = vld [vmem:[#allocation10 + $0x1a8] ss:$16 sps:$4 sm:$0xff]   ;;  %v3320_v52 = vld [vmem:[#allocation10 + $0x1c4] ss:$16 sps:$4 sm:$0xff]  }
 0x1a0   :  { %1142 = vmatpush1.bf16.msra.mxu0 %v3228_v53  ;;  %1224 = vmatpush1.bf16.msra.mxu1 %v3231_v54  ;;  %v3323_v53 = vld [vmem:[#allocation10 + $0x1cc] ss:$16 sps:$4 sm:$0xff]   ;;  %v3318_v54 = vld [vmem:[#allocation10 + $0x1c0] ss:$16 sps:$4 sm:$0xff]  }
 0x1a1   :  { %2068 = vmatprep.subr.bf16.mxu0 %v3236_v56  ;;  %2150 = vmatprep.subr.bf16.mxu1 %v3239_v57  ;;  %v3326_v56 = vld [vmem:[#allocation10 + $0x1e4] ss:$16 sps:$4 sm:$0xff]   ;;  %v3329_v57 = vld [vmem:[#allocation10 + $0x1ec] ss:$16 sps:$4 sm:$0xff]  }
 0x1a3   :  { %1144 = vmatmul.mubr.bf16.vlgmr.msra.gmra.mrb[4].mxu0 %v300_v34  ;;  %1226 = vmatmul.mubr.bf16.vlgmr.msra.gmra.mrb[4].mxu1 %v300_v34  ;;  %v3332_v34 = vld [vmem:[#allocation10 + $0x204] ss:$16 sps:$4 sm:$0xff]  }
 0x1a4   :  { %2069 = vmatpush1.bf16.msra.mxu0 %v3234_v58  ;;  %2151 = vmatpush1.bf16.msra.mxu1 %v3237_v59  ;;  %v3324_v58 = vld [vmem:[#allocation10 + $0x1e0] ss:$16 sps:$4 sm:$0xff]   ;;  %v3327_v59 = vld [vmem:[#allocation10 + $0x1e8] ss:$16 sps:$4 sm:$0xff]  }
 0x1a5   :  { %2070 = vmatprep.subr.bf16.mxu0 %v3242_v60  ;;  %2152 = vmatprep.subr.bf16.mxu1 %v3245_v61  ;;  %v3335_v60 = vld [vmem:[#allocation10 + $0x20c] ss:$16 sps:$4 sm:$0xff]  }
 0x1a6   :  { %v2799_v61 = vld.sshfl [vmem:[#allocation8] sm:$0x33 pattern:$0x75316420] }
 0x1a8   :  { %2071 = vmatpush1.bf16.msra.mxu0 %v3240_v62  ;;  %2153 = vmatpush1.bf16.msra.mxu1 %v3243_v63  ;;  %v1247_v62 = vcombine.high %v2799_v61, %v2799_v61 }
 0x1a9   :  { %2072 = vmatprep.subr.bf16.mxu0 %v3248_v1  ;;  %2154 = vmatprep.subr.bf16.mxu1 %v3251_v2  ;;  %v3839_v1 = vrot.slane %v2799_v61, %v3813_v20  ;;  %v3381_v61 = vld [vmem:[#allocation10 + $0x308] ss:$16 sps:$4 sm:$0xff]  }
 0x1aa   :  { %v1261_v63 = vrot.slane %v1247_v62, %v3813_v20  ;;  %v3386_v62 = vld [vmem:[#allocation10 + $0x324] ss:$16 sps:$4 sm:$0xff]  }
 0x1ac   :  { %2073 = vmatpush1.bf16.msra.mxu0 %v3246_v3  ;;  %2155 = vmatpush1.bf16.msra.mxu1 %v3249_v4  ;;  %v1263_v2 = vcombine.high %v1261_v63, %v1261_v63  ;;  %v1265_v3 = vpack.i.b16 %v3839_v1, %v3839_v1  ;;  %v1272_v4 = vpack.i.b16 %v1261_v63, %v1261_v63  ;;  %v3389_v63 = vld [vmem:[#allocation10 + $0x32c] ss:$16 sps:$4 sm:$0xff]  }
 0x1ad   :  { %2074 = vmatprep.subr.bf16.mxu0 %v3254_v5  ;;  %2156 = vmatprep.subr.bf16.mxu1 %v3257_v6 }
 0x1ae   :  { %v1286_v5 = vpack.i.b16 %v1263_v2, %v1263_v2  ;;  %v1270_v6 = vrot.slane %v1265_v3, %v3821_v26  ;;  %v3384_v2 = vld [vmem:[#allocation10 + $0x320] ss:$16 sps:$4 sm:$0xff]   ;;  %v3387_v3 = vld [vmem:[#allocation10 + $0x328] ss:$16 sps:$4 sm:$0xff]  }
 0x1b0   :  { %2075 = vmatpush1.bf16.msra.mxu0 %v3252_v7  ;;  %2157 = vmatpush1.bf16.msra.mxu1 %v3255_v8 }
 0x1b1   :  { %2076 = vmatprep.subr.bf16.mxu0 %v3260_v9  ;;  %2158 = vmatprep.subr.bf16.mxu1 %v3263_v10  ;;  %v1277_v9 = vrot.slane %v1272_v4, %v3821_v26  ;;  %v3392_v4 = vld [vmem:[#allocation10 + $0x344] ss:$16 sps:$4 sm:$0xff]  }
 0x1b4   :  { %2077 = vmatpush1.bf16.msra.mxu0 %v3258_v11  ;;  %2159 = vmatpush1.bf16.msra.mxu1 %v3261_v12 }
 0x1b5   :  { %2078 = vmatprep.subr.bf16.mxu0 %v3266_v13  ;;  %2160 = vmatprep.subr.bf16.mxu1 %v3269_v14  ;;  %v1291_v13 = vrot.slane %v1286_v5, %v3821_v26  ;;  %v3395_v5 = vld [vmem:[#allocation10 + $0x34c] ss:$16 sps:$4 sm:$0xff]  }
 0x1b8   :  { %2079 = vmatpush1.bf16.msra.mxu0 %v3264_v15  ;;  %2161 = vmatpush1.bf16.msra.mxu1 %v3267_v16 }
 0x1b9   :  { %2080 = vmatprep.subr.bf16.mxu0 %v3272_v17  ;;  %2162 = vmatprep.subr.bf16.mxu1 %v3275_v18 }
 0x1bc   :  { %2081 = vmatpush1.bf16.msra.mxu0 %v3270_v19  ;;  %2163 = vmatpush1.bf16.msra.mxu1 %v3273_v21 }
 0x1bd   :  { %2082 = vmatprep.subr.bf16.mxu0 %v3278_v23  ;;  %2164 = vmatprep.subr.bf16.mxu1 %v3281_v24 }
 0x1c0   :  { %2083 = vmatpush1.bf16.msra.mxu0 %v3276_v25  ;;  %2165 = vmatpush1.bf16.msra.mxu1 %v3279_v27  ;;  %v3330_v27 = vld [vmem:[#allocation10 + $0x200] ss:$16 sps:$4 sm:$0xff]  }
 0x1c1   :  { %2084 = vmatprep.subr.bf16.mxu0 %v3284_v28  ;;  %2166 = vmatprep.subr.bf16.mxu1 %v3287_v29  ;;  %v3333_v28 = vld [vmem:[#allocation10 + $0x208] ss:$16 sps:$4 sm:$0xff]  }
 0x1c4   :  { %2085 = vmatpush1.bf16.msra.mxu0 %v3282_v30  ;;  %2167 = vmatpush1.bf16.msra.mxu1 %v3285_v31  ;;  %v3338_v30 = vld [vmem:[#allocation10 + $0x224] ss:$16 sps:$4 sm:$0xff]   ;;  %v3341_v31 = vld [vmem:[#allocation10 + $0x22c] ss:$16 sps:$4 sm:$0xff]  }
 0x1c5   :  { %2086 = vmatprep.subr.bf16.mxu0 %v3290_v32  ;;  %2168 = vmatprep.subr.bf16.mxu1 %v3293_v33  ;;  %v3336_v33 = vld [vmem:[#allocation10 + $0x220] ss:$16 sps:$4 sm:$0xff]  }
 0x1c8   :  { %2087 = vmatpush1.bf16.msra.mxu0 %v3288_v35  ;;  %2169 = vmatpush1.bf16.msra.mxu1 %v3291_v36  ;;  %v3339_v35 = vld [vmem:[#allocation10 + $0x228] ss:$16 sps:$4 sm:$0xff]   ;;  %v3344_v36 = vld [vmem:[#allocation10 + $0x244] ss:$16 sps:$4 sm:$0xff]  }
 0x1c9   :  { %2088 = vmatprep.subr.bf16.mxu0 %v3296_v37  ;;  %2170 = vmatprep.subr.bf16.mxu1 %v3299_v38  ;;  %v3347_v37 = vld [vmem:[#allocation10 + $0x24c] ss:$16 sps:$4 sm:$0xff]   ;;  %v3342_v38 = vld [vmem:[#allocation10 + $0x240] ss:$16 sps:$4 sm:$0xff]  }
 0x1cc   :  { %2089 = vmatpush1.bf16.msra.mxu0 %v3294_v39  ;;  %2171 = vmatpush1.bf16.msra.mxu1 %v3297_v40  ;;  %v3345_v39 = vld [vmem:[#allocation10 + $0x248] ss:$16 sps:$4 sm:$0xff]   ;;  %v3350_v40 = vld [vmem:[#allocation10 + $0x264] ss:$16 sps:$4 sm:$0xff]  }
 0x1cd   :  { %2090 = vmatprep.subr.bf16.mxu0 %v3302_v41  ;;  %2172 = vmatprep.subr.bf16.mxu1 %v3305_v42  ;;  %v3353_v41 = vld [vmem:[#allocation10 + $0x26c] ss:$16 sps:$4 sm:$0xff]   ;;  %v3348_v42 = vld [vmem:[#allocation10 + $0x260] ss:$16 sps:$4 sm:$0xff]  }
 0x1d0   :  { %2091 = vmatpush1.bf16.msra.mxu0 %v3300_v43  ;;  %2173 = vmatpush1.bf16.msra.mxu1 %v3303_v44  ;;  %v3351_v43 = vld [vmem:[#allocation10 + $0x268] ss:$16 sps:$4 sm:$0xff]   ;;  %v3356_v44 = vld [vmem:[#allocation10 + $0x284] ss:$16 sps:$4 sm:$0xff]  }
 0x1d1   :  { %2092 = vmatprep.subr.bf16.mxu0 %v3308_v45  ;;  %2174 = vmatprep.subr.bf16.mxu1 %v3311_v46  ;;  %v3359_v45 = vld [vmem:[#allocation10 + $0x28c] ss:$16 sps:$4 sm:$0xff]   ;;  %v3354_v46 = vld [vmem:[#allocation10 + $0x280] ss:$16 sps:$4 sm:$0xff]  }
 0x1d4   :  { %2093 = vmatpush1.bf16.msra.mxu0 %v3306_v47  ;;  %2175 = vmatpush1.bf16.msra.mxu1 %v3309_v48  ;;  %v3357_v47 = vld [vmem:[#allocation10 + $0x288] ss:$16 sps:$4 sm:$0xff]   ;;  %v3362_v48 = vld [vmem:[#allocation10 + $0x2a4] ss:$16 sps:$4 sm:$0xff]  }
 0x1d5   :  { %2094 = vmatprep.subr.bf16.mxu0 %v3314_v49  ;;  %2176 = vmatprep.subr.bf16.mxu1 %v3317_v50  ;;  %v3365_v49 = vld [vmem:[#allocation10 + $0x2ac] ss:$16 sps:$4 sm:$0xff]   ;;  %v3360_v50 = vld [vmem:[#allocation10 + $0x2a0] ss:$16 sps:$4 sm:$0xff]  }
 0x1d8   :  { %2095 = vmatpush1.bf16.msra.mxu0 %v3312_v22  ;;  %2177 = vmatpush1.bf16.msra.mxu1 %v3315_v51  ;;  %v3363_v22 = vld [vmem:[#allocation10 + $0x2a8] ss:$16 sps:$4 sm:$0xff]   ;;  %v3368_v51 = vld [vmem:[#allocation10 + $0x2c4] ss:$16 sps:$4 sm:$0xff]  }
 0x1d9   :  { %2096 = vmatprep.subr.bf16.mxu0 %v3320_v52  ;;  %2178 = vmatprep.subr.bf16.mxu1 %v3323_v53  ;;  %v3371_v52 = vld [vmem:[#allocation10 + $0x2cc] ss:$16 sps:$4 sm:$0xff]   ;;  %v3366_v53 = vld [vmem:[#allocation10 + $0x2c0] ss:$16 sps:$4 sm:$0xff]  }
 0x1dc   :  { %2097 = vmatpush1.bf16.msra.mxu0 %v3318_v54  ;;  %2179 = vmatpush1.bf16.msra.mxu1 %v3321_v55  ;;  %v3369_v54 = vld [vmem:[#allocation10 + $0x2c8] ss:$16 sps:$4 sm:$0xff]   ;;  %v3374_v55 = vld [vmem:[#allocation10 + $0x2e4] ss:$16 sps:$4 sm:$0xff]  }
 0x1dd   :  { %2098 = vmatprep.subr.bf16.mxu0 %v3326_v56  ;;  %2180 = vmatprep.subr.bf16.mxu1 %v3329_v57  ;;  %v3377_v56 = vld [vmem:[#allocation10 + $0x2ec] ss:$16 sps:$4 sm:$0xff]   ;;  %v3372_v57 = vld [vmem:[#allocation10 + $0x2e0] ss:$16 sps:$4 sm:$0xff]  }
 0x1e0   :  { %2099 = vmatpush1.bf16.msra.mxu0 %v3324_v58  ;;  %2181 = vmatpush1.bf16.msra.mxu1 %v3327_v59  ;;  %v3375_v58 = vld [vmem:[#allocation10 + $0x2e8] ss:$16 sps:$4 sm:$0xff]   ;;  %v3380_v59 = vld [vmem:[#allocation10 + $0x304] ss:$16 sps:$4 sm:$0xff]  }
 0x1e1   :  { %2109 = vmatprep.subr.bf16.mxu0 %v3332_v34  ;;  %2191 = vmatprep.subr.bf16.mxu1 %v3335_v60  ;;  %v3383_v34 = vld [vmem:[#allocation10 + $0x30c] ss:$16 sps:$4 sm:$0xff]   ;;  %v3378_v60 = vld [vmem:[#allocation10 + $0x300] ss:$16 sps:$4 sm:$0xff]  }
 0x276   :  { %v1145_v7 = vpop.f32.mrb[4].mxu0  ;;  %v3844_v8 = vpop.f32.mrb[4].mxu1 }
 0x277   :  { %v1234_v10 = vpack.c.bf16 %v1145_v7, %v1145_v7  ;;  %v1147_v11 = vpop.f32.mrb[5].mxu0  ;;  %v1229_v12 = vpop.f32.mrb[5].mxu1  ;;  %v3393_v7 = vld [vmem:[#allocation10 + $0x348] ss:$16 sps:$4 sm:$0xff]  }
 0x278   :  { %v1235_v14 = vpack.c.bf16 %v1147_v11, %v1147_v11  ;;  %v1237_v15 = vpack.c.bf16 %v1229_v12, %v1229_v12  ;;  %v1149_v16 = vpop.f32.mrb[6].mxu0  ;;  %v1231_v17 = vpop.f32.mrb[6].mxu1  ;;  %v3396_v11 = vld [vmem:[#allocation10 + $0x360] ss:$16 sps:$4 sm:$0xff]   ;;  %v3399_v12 = vld [vmem:[#allocation10 + $0x368] ss:$16 sps:$4 sm:$0xff]  }
 0x279   :  { %v1292_v18 = vadd.bf16 %v1270_v6, %v1234_v10  ;;  %v1150_v19 = vpop.f32.mrb[7].mxu0  ;;  %v1232_v21 = vpop.f32.mrb[7].mxu1  ;;  %v3390_v6 = vld [vmem:[#allocation10 + $0x340] ss:$16 sps:$4 sm:$0xff]   ;;  %v3401_v10 = vld [vmem:[#allocation10 + $0x36c] ss:$16 sps:$4 sm:$0xff]   ;;  %v1262_v17 = vcombine.high %v3839_v1, %v3839_v1  ;;  %v1236_v1 = vpack.c.bf16 %v3844_v8, %v3844_v8 }
 0x27a   :  { %v1293_v23 = vadd.bf16 %v1277_v9, %v1235_v14  ;;  %v1295_v24 = vadd.bf16 %v1291_v13, %v1237_v15  ;;  %v3398_v9 = vld [vmem:[#allocation10 + $0x364] ss:$16 sps:$4 sm:$0xff]   ;;  %v3407_v14 = vld [vmem:[#allocation10 + $0x38c] ss:$16 sps:$4 sm:$0xff]   ;;  %v3402_v15 = vld [vmem:[#allocation10 + $0x380] ss:$16 sps:$4 sm:$0xff]  }
 0x27b   :  { %v1296_v29 = vmax.bf16 %v3657_v0, %v1292_v18  ;;  %v3404_v13 = vld [vmem:[#allocation10 + $0x384] ss:$16 sps:$4 sm:$0xff]   ;;  %v3405_v16 = vld [vmem:[#allocation10 + $0x388] ss:$16 sps:$4 sm:$0xff]   ;;  %v3413_v19 = vld [vmem:[#allocation10 + $0x3ac] ss:$16 sps:$4 sm:$0xff]  }
 0x27c   :  { %v1297_v25 = vmax.bf16 %v3657_v0, %v1293_v23  ;;  %v1299_v32 = vmax.bf16 %v3657_v0, %v1295_v24  ;;  %v3410_v18 = vld [vmem:[#allocation10 + $0x3a4] ss:$16 sps:$4 sm:$0xff]   ;;  %v3408_v21 = vld [vmem:[#allocation10 + $0x3a0] ss:$16 sps:$4 sm:$0xff]   ;;  %v3411_v23 = vld [vmem:[#allocation10 + $0x3a8] ss:$16 sps:$4 sm:$0xff]   ;;  %v1279_v24 = vpack.i.b16 %v1262_v17, %v1262_v17 }
 0x27e   :  { %2100 = vmatprep.mubr.bf16.mxu0 %v1297_v25  ;;  %2182 = vmatprep.mubr.bf16.mxu1 %v1297_v25  ;;  %v3416_v25 = vld [vmem:[#allocation10 + $0x3c4] ss:$16 sps:$4 sm:$0xff]  }
 0x27f   :  { %2101 = vmatmul.mubr.bf16.vlgmr.msra.gmra.mrb[8].mxu0 %v1296_v29  ;;  %2183 = vmatmul.mubr.bf16.vlgmr.msra.gmra.mrb[8].mxu1 %v1296_v29  ;;  %v3417_v29 = vld [vmem:[#allocation10 + $0x3c8] ss:$16 sps:$4 sm:$0xff]  }
 0x280   :  { %2110 = vmatpush1.bf16.msra.mxu0 %v3330_v27  ;;  %2192 = vmatpush1.bf16.msra.mxu1 %v3333_v28  ;;  %v3419_v27 = vld [vmem:[#allocation10 + $0x3cc] ss:$16 sps:$4 sm:$0xff]   ;;  %v3414_v28 = vld [vmem:[#allocation10 + $0x3c0] ss:$16 sps:$4 sm:$0xff]  }
 0x281   :  { %2141 = vmatprep.mubr.bf16.mxu0 %v1299_v32  ;;  %2223 = vmatprep.mubr.bf16.mxu1 %v1299_v32  ;;  %v3425_v32 = vld [vmem:[#allocation10 + $0x3ec] ss:$16 sps:$4 sm:$0xff]  }
 0x282   :  { %2111 = vmatprep.subr.bf16.mxu0 %v3338_v30  ;;  %2193 = vmatprep.subr.bf16.mxu1 %v3341_v31  ;;  %v1284_v30 = vrot.slane %v1279_v24, %v3821_v26  ;;  %v3422_v31 = vld [vmem:[#allocation10 + $0x3e4] ss:$16 sps:$4 sm:$0xff]  }
 0x284   :  { %2112 = vmatpush1.bf16.msra.mxu0 %v3336_v33  ;;  %2194 = vmatpush1.bf16.msra.mxu1 %v3339_v35  ;;  %v3420_v33 = vld [vmem:[#allocation10 + $0x3e0] ss:$16 sps:$4 sm:$0xff]   ;;  %v3423_v35 = vld [vmem:[#allocation10 + $0x3e8] ss:$16 sps:$4 sm:$0xff]  }
 0x285   :  { %2113 = vmatprep.subr.bf16.mxu0 %v3344_v36  ;;  %2195 = vmatprep.subr.bf16.mxu1 %v3347_v37  ;;  %v1294_v36 = vadd.bf16 %v1284_v30, %v1236_v1  ;;  %v3426_v37 = vld [vmem:[#allocation13 + $0x40] sm:$0xff]  }
 0x287   :  { %v1298_v8 = vmax.bf16 %v3657_v0, %v1294_v36 }
 0x288   :  { %2114 = vmatpush1.bf16.msra.mxu0 %v3342_v38  ;;  %2196 = vmatpush1.bf16.msra.mxu1 %v3345_v39  ;;  %v3427_v38 = vld [vmem:[#allocation13 + $0xc0] sm:$0xff]  }
 0x289   :  { %2115 = vmatprep.subr.bf16.mxu0 %v3350_v40  ;;  %2197 = vmatprep.subr.bf16.mxu1 %v3353_v41  ;;  %v3428_v39 = vld [vmem:[#allocation13] sm:$0xff]   ;;  %v3430_v41 = vld [vmem:[#allocation13 + $0x48] sm:$0xff]  }
 0x28a   :  { %v3429_v40 = vld [vmem:[#allocation13 + $0x80] sm:$0xff]  }
 0x28c   :  { %2116 = vmatpush1.bf16.msra.mxu0 %v3348_v42  ;;  %2198 = vmatpush1.bf16.msra.mxu1 %v3351_v43  ;;  %v3431_v42 = vld [vmem:[#allocation13 + $0xc8] sm:$0xff]  }
 0x28d   :  { %2117 = vmatprep.subr.bf16.mxu0 %v3356_v44  ;;  %2199 = vmatprep.subr.bf16.mxu1 %v3359_v45  ;;  %v3432_v43 = vld [vmem:[#allocation13 + $0x8] sm:$0xff]   ;;  %v3434_v45 = vld [vmem:[#allocation13 + $0x50] sm:$0xff]  }
 0x28e   :  { %v3433_v44 = vld [vmem:[#allocation13 + $0x88] sm:$0xff]  }
 0x290   :  { %2118 = vmatpush1.bf16.msra.mxu0 %v3354_v46  ;;  %2200 = vmatpush1.bf16.msra.mxu1 %v3357_v47  ;;  %v3435_v46 = vld [vmem:[#allocation13 + $0xd0] sm:$0xff]  }
 0x291   :  { %2119 = vmatprep.subr.bf16.mxu0 %v3362_v48  ;;  %2201 = vmatprep.subr.bf16.mxu1 %v3365_v49  ;;  %v3436_v47 = vld [vmem:[#allocation13 + $0x10] sm:$0xff]   ;;  %v3438_v49 = vld [vmem:[#allocation13 + $0x58] sm:$0xff]  }
 0x292   :  { %v3437_v48 = vld [vmem:[#allocation13 + $0x90] sm:$0xff]  }
 0x294   :  { %2120 = vmatpush1.bf16.msra.mxu0 %v3360_v50  ;;  %2202 = vmatpush1.bf16.msra.mxu1 %v3363_v22  ;;  %v3439_v50 = vld [vmem:[#allocation13 + $0xd8] sm:$0xff]  }
 0x295   :  { %2121 = vmatprep.subr.bf16.mxu0 %v3368_v51  ;;  %2203 = vmatprep.subr.bf16.mxu1 %v3371_v52  ;;  %v3440_v22 = vld [vmem:[#allocation13 + $0x18] sm:$0xff]   ;;  %v3442_v52 = vld [vmem:[#allocation13 + $0x60] sm:$0xff]  }
 0x296   :  { %v3441_v51 = vld [vmem:[#allocation13 + $0x98] sm:$0xff]  }
 0x298   :  { %2122 = vmatpush1.bf16.msra.mxu0 %v3366_v53  ;;  %2204 = vmatpush1.bf16.msra.mxu1 %v3369_v54  ;;  %v3443_v53 = vld [vmem:[#allocation13 + $0xe0] sm:$0xff]  }
 0x299   :  { %2123 = vmatprep.subr.bf16.mxu0 %v3374_v55  ;;  %2205 = vmatprep.subr.bf16.mxu1 %v3377_v56  ;;  %v3444_v54 = vld [vmem:[#allocation13 + $0x20] sm:$0xff]   ;;  %v3446_v56 = vld [vmem:[#allocation13 + $0x68] sm:$0xff]  }
 0x29a   :  { %v3445_v55 = vld [vmem:[#allocation13 + $0xa0] sm:$0xff]  }
 0x29c   :  { %2124 = vmatpush1.bf16.msra.mxu0 %v3372_v57  ;;  %2206 = vmatpush1.bf16.msra.mxu1 %v3375_v58  ;;  %v3447_v57 = vld [vmem:[#allocation13 + $0xe8] sm:$0xff]  }
 0x29d   :  { %2125 = vmatprep.subr.bf16.mxu0 %v3380_v59  ;;  %2207 = vmatprep.subr.bf16.mxu1 %v3383_v34  ;;  %v3448_v58 = vld [vmem:[#allocation13 + $0x28] sm:$0xff]   ;;  %v3450_v34 = vld [vmem:[#allocation13 + $0x70] sm:$0xff]  }
 0x29e   :  { %v3449_v59 = vld [vmem:[#allocation13 + $0xa8] sm:$0xff]  }
 0x2a0   :  { %2126 = vmatpush1.bf16.msra.mxu0 %v3378_v60  ;;  %2208 = vmatpush1.bf16.msra.mxu1 %v3381_v61  ;;  %v3451_v60 = vld [vmem:[#allocation13 + $0xf0] sm:$0xff]  }
 0x2a1   :  { %2127 = vmatprep.subr.bf16.mxu0 %v3386_v62  ;;  %2209 = vmatprep.subr.bf16.mxu1 %v3389_v63  ;;  %v3452_v61 = vld [vmem:[#allocation13 + $0x30] sm:$0xff]   ;;  %v3454_v63 = vld [vmem:[#allocation13 + $0x78] sm:$0xff]  }
 0x2a2   :  { %v3453_v62 = vld [vmem:[#allocation13 + $0xb0] sm:$0xff]  }
 0x2a4   :  { %2128 = vmatpush1.bf16.msra.mxu0 %v3384_v2  ;;  %2210 = vmatpush1.bf16.msra.mxu1 %v3387_v3  ;;  %v3455_v2 = vld [vmem:[#allocation13 + $0xf8] sm:$0xff]  }
 0x2a5   :  { %2129 = vmatprep.subr.bf16.mxu0 %v3392_v4  ;;  %2211 = vmatprep.subr.bf16.mxu1 %v3395_v5  ;;  %v3456_v3 = vld [vmem:[#allocation13 + $0x38] sm:$0xff]  }
 0x2a6   :  { %v3457_v4 = vld [vmem:[#allocation13 + $0xb8] sm:$0xff]  }
 0x2a7   :  { %v2928_v5 = vld.sshfl [vmem:[#allocation11] sm:$0x33 pattern:$0x75316420] }
 0x2a8   :  { %2130 = vmatpush1.bf16.msra.mxu0 %v3390_v6  ;;  %2212 = vmatpush1.bf16.msra.mxu1 %v3393_v7  ;;  %v2245_v6 = vcombine.high %v2928_v5, %v2928_v5  ;;  %v2252_v7 = vrot.slane %v2928_v5, %v3813_v20 }
 0x2a9   :  { %2131 = vmatprep.subr.bf16.mxu0 %v3398_v9  ;;  %2213 = vmatprep.subr.bf16.mxu1 %v3401_v10 }
 0x2aa   :  { %v2259_v9 = vrot.slane %v2245_v6, %v3813_v20  ;;  %v2260_v10 = vcombine.high %v2252_v7, %v2252_v7 }
 0x2ac   :  { %2132 = vmatpush1.bf16.msra.mxu0 %v3396_v11  ;;  %2214 = vmatpush1.bf16.msra.mxu1 %v3399_v12  ;;  %v2261_v11 = vcombine.high %v2259_v9, %v2259_v9  ;;  %v2263_v12 = vpack.i.b16 %v2252_v7, %v2252_v7 }
 0x2ad   :  { %2133 = vmatprep.subr.bf16.mxu0 %v3404_v13  ;;  %2215 = vmatprep.subr.bf16.mxu1 %v3407_v14  ;;  %v2277_v13 = vpack.i.b16 %v2260_v10, %v2260_v10  ;;  %v2270_v14 = vpack.i.b16 %v2259_v9, %v2259_v9 }
 0x2af   :  { %v2282_v17 = vrot.slane %v2277_v13, %v3821_v26 }
 0x2b0   :  { %2134 = vmatpush1.bf16.msra.mxu0 %v3402_v15  ;;  %2216 = vmatpush1.bf16.msra.mxu1 %v3405_v16  ;;  %v2284_v15 = vpack.i.b16 %v2261_v11, %v2261_v11  ;;  %v2268_v16 = vrot.slane %v2263_v12, %v3821_v26 }
 0x2b1   :  { %2135 = vmatprep.subr.bf16.mxu0 %v3410_v18  ;;  %2217 = vmatprep.subr.bf16.mxu1 %v3413_v19 }
 0x2b4   :  { %2136 = vmatpush1.bf16.msra.mxu0 %v3408_v21  ;;  %2218 = vmatpush1.bf16.msra.mxu1 %v3411_v23  ;;  %v2275_v21 = vrot.slane %v2270_v14, %v3821_v26  ;;  %v2289_v23 = vrot.slane %v2284_v15, %v3821_v26 }
 0x2b5   :  { %2137 = vmatprep.subr.bf16.mxu0 %v3416_v25  ;;  %2219 = vmatprep.subr.bf16.mxu1 %v3419_v27 }
 0x2b8   :  { %2138 = vmatpush1.bf16.msra.mxu0 %v3414_v28  ;;  %2220 = vmatpush1.bf16.msra.mxu1 %v3417_v29 }
 0x2b9   :  { %2139 = vmatprep.subr.bf16.mxu0 %v3422_v31  ;;  %2221 = vmatprep.subr.bf16.mxu1 %v3425_v32 }
 0x2bc   :  { %2140 = vmatpush1.bf16.msra.mxu0 %v3420_v33  ;;  %2222 = vmatpush1.bf16.msra.mxu1 %v3423_v35 }
 0x2bd   :  { %2962 = vmatprep.subr.bf16.mxu0 %v3426_v37  ;;  %2984 = vmatprep.subr.bf16.mxu1 %v3427_v38 }
 0x2bf   :  { %2142 = vmatmul.mubr.bf16.vlgmr.msra.gmra.mrb[8].mxu0 %v1298_v8  ;;  %2224 = vmatmul.mubr.bf16.vlgmr.msra.gmra.mrb[8].mxu1 %v1298_v8 }
 0x2c0   :  { %2963 = vmatpush3.bf16.msra.mxu0 %v3428_v39  ;;  %2985 = vmatpush3.bf16.msra.mxu1 %v3429_v40 }
 0x2c1   :  { %2964 = vmatprep.subr.bf16.mxu0 %v3430_v41  ;;  %2986 = vmatprep.subr.bf16.mxu1 %v3431_v42  ;;  %v2929_v42 = vld [vmem:[%s3893_s8] ss:$0 sm:$0xff] }
 0x2c4   :  { %2965 = vmatpush3.bf16.msra.mxu0 %v3432_v43  ;;  %2987 = vmatpush3.bf16.msra.mxu1 %v3433_v44 }
 0x2c5   :  { %2966 = vmatprep.subr.bf16.mxu0 %v3434_v45  ;;  %2988 = vmatprep.subr.bf16.mxu1 %v3435_v46 }
 0x2c8   :  { %2967 = vmatpush3.bf16.msra.mxu0 %v3436_v47  ;;  %2989 = vmatpush3.bf16.msra.mxu1 %v3437_v48 }
 0x2c9   :  { %2968 = vmatprep.subr.bf16.mxu0 %v3438_v49  ;;  %2990 = vmatprep.subr.bf16.mxu1 %v3439_v50 }
 0x2cc   :  { %2969 = vmatpush3.bf16.msra.mxu0 %v3440_v22  ;;  %2991 = vmatpush3.bf16.msra.mxu1 %v3441_v51 }
 0x2cd   :  { %2970 = vmatprep.subr.bf16.mxu0 %v3442_v52  ;;  %2992 = vmatprep.subr.bf16.mxu1 %v3443_v53 }
 0x2d0   :  { %2971 = vmatpush3.bf16.msra.mxu0 %v3444_v54  ;;  %2993 = vmatpush3.bf16.msra.mxu1 %v3445_v55 }
 0x2d1   :  { %2972 = vmatprep.subr.bf16.mxu0 %v3446_v56  ;;  %2994 = vmatprep.subr.bf16.mxu1 %v3447_v57 }
 0x2d4   :  { %2973 = vmatpush3.bf16.msra.mxu0 %v3448_v58  ;;  %2995 = vmatpush3.bf16.msra.mxu1 %v3449_v59 }
 0x2d5   :  { %2974 = vmatprep.subr.bf16.mxu0 %v3450_v34  ;;  %2996 = vmatprep.subr.bf16.mxu1 %v3451_v60 }
 0x2d8   :  { %2975 = vmatpush3.bf16.msra.mxu0 %v3452_v61  ;;  %2997 = vmatpush3.bf16.msra.mxu1 %v3453_v62 }
 0x2d9   :  { %2976 = vmatprep.subr.bf16.mxu0 %v3454_v63  ;;  %2998 = vmatprep.subr.bf16.mxu1 %v3455_v2 }
 0x2dc   :  { %2977 = vmatpush3.bf16.msra.mxu0 %v3456_v3  ;;  %2999 = vmatpush3.bf16.msra.mxu1 %v3457_v4 }
 0x392   :  { %v2143_v18 = vpop.f32.mrb[8].mxu0  ;;  %v2225_v19 = vpop.f32.mrb[8].mxu1 }
 0x393   :  { %v2232_v24 = vpack.c.bf16 %v2143_v18, %v2143_v18  ;;  %v2234_v25 = vpack.c.bf16 %v2225_v19, %v2225_v19  ;;  %v2145_v27 = vpop.f32.mrb[9].mxu0  ;;  %v2227_v20 = vpop.f32.mrb[9].mxu1 }
 0x394   :  { %v2233_v28 = vpack.c.bf16 %v2145_v27, %v2145_v27  ;;  %v2235_v29 = vpack.c.bf16 %v2227_v20, %v2227_v20  ;;  %v2147_v1 = vpop.f32.mrb[10].mxu0  ;;  %v2229_v30 = vpop.f32.mrb[10].mxu1 }
 0x395   :  { %v2290_v31 = vadd.bf16 %v2268_v16, %v2232_v24  ;;  %v2292_v32 = vadd.bf16 %v2282_v17, %v2234_v25  ;;  %v2148_v33 = vpop.f32.mrb[11].mxu0  ;;  %v2230_v35 = vpop.f32.mrb[11].mxu1 }
 0x396   :  { %v2291_v36 = vadd.bf16 %v2275_v21, %v2233_v28  ;;  %v2293_v37 = vadd.bf16 %v2289_v23, %v2235_v29 }
 0x397   :  { %v2294_v26 = vmax.bf16 %v3657_v0, %v2290_v31  ;;  %v2296_v40 = vmax.bf16 %v3657_v0, %v2292_v32 }
 0x398   :  { %v2295_v38 = vmax.bf16 %v3657_v0, %v2291_v36  ;;  %v2297_v39 = vmax.bf16 %v3657_v0, %v2293_v37 }
 0x39a   :  { %2593 = vmatprep.mubr.bf16.mxu0 %v2295_v38  ;;  %2633 = vmatprep.mubr.bf16.mxu1 %v2297_v39 }
 0x39b   :  { %2594 = vmatmul.mubr.bf16.vlgmr.msra.gmra.mrb[12].mxu0 %v2294_v26  ;;  %2634 = vmatmul.mubr.bf16.vlgmr.msra.gmra.mrb[12].mxu1 %v2296_v40 }
 0x46e   :  { %v2978_v8 = vpop.f32.mrb[12].mxu0  ;;  %v3000_v41 = vpop.f32.mrb[12].mxu1 }
 0x46f   :  { %v2979_v43 = vpop.f32.mrb[13].mxu0  ;;  %v3001_v44 = vpop.f32.mrb[13].mxu1 }
 0x470   :  { %v2980_v45 = vadd.f32 %v2979_v43, %v2978_v8  ;;  %v3002_v46 = vadd.f32 %v3001_v44, %v3000_v41  ;;  %v2981_v47 = vpop.f32.mrb[14].mxu0  ;;  %v3003_v48 = vpop.f32.mrb[14].mxu1 }
 0x471   :  { %v2982_v49 = vpop.f32.mrb[15].mxu0  ;;  %v3004_v50 = vpop.f32.mrb[15].mxu1 }
 0x472   :  { %v2596_v22 = vadd.f32 %v2980_v45, %v2929_v42 }
 0x474   :  { %v2636_v0 = vadd.f32 %v3002_v46, %v2596_v22 }
 0x476   :  { %2641 = vst [vmem:[#allocation14] sm:$0xff] %v2636_v0 }
 0x477   :  { %2646 = vsyncadd [#allocation4], 96  ;;  %s3659_s2 = smov [#allocation14]  }
 0x478   :  { %s2647_s6 = sshll.u32 %s3659_s2, 4  ;;  %s2648_s6 = int_to_ptr.vmem [resolvable:$true] %s2647_s6 }
 0x479   :  { %s3612_s13 = scalar_lea.vmem %s2648_s6, 32  ;;  %s3616_s14 = scalar_lea.vmem %s2648_s6, 128 }
 0x47a   :  { %p3613_p0 = scmp.ne.s32.totalorder %s2648_s6, %s3612_s13  ;;  %p3617_p1 = scmp.lt.s32.totalorder %s2648_s6, %s2648_s6 }
 0x47b   :  { %p3618_p2 = scmp.lt.s32.totalorder %s3616_s14, %s3612_s13 }
 0x47d   :  { %p3619_p3 = por %p3618_p2, %p3617_p1 }
 0x47f   :  { %p3620_p4 = pnand %p3619_p3, %p3613_p0 }
 0x481   :  { %3623 = shalt.err (!%p3620_p4)
}
 0x482   :  { %s3624_s18 = scalar_lea.hbm %s3894_s9, 32 }
 0x483   :  { %p3625_p5 = scmp.ne.s32.totalorder %s3894_s9, %s3624_s18  ;;  %p3628_p6 = scmp.lt.u32.totalorder %s3624_s18, %s3894_s9 }
 0x485   :  { %p3630_p7 = pnand %p3628_p6, %p3625_p5 }
 0x487   :  { %3633 = shalt.err (!%p3630_p7)
}
 0x488   :  { %2653 = dma.vmem_to_hbm [thread:$0]  %s2648_s6, 32, %s3894_s9, [#allocation4], %s3648_s10, %s3648_s10, %s3649_s11  }
 0x489   :  { %3642 = dma.done.wait [#allocation4], 128  }
 0x48a   :  { %3643 = vsyncadd [#allocation4], 4294967168 }
 0x48b   :  { %2657 = vsyncpa [#allocation3], 1 }
 0x48c   :  { %2658 = vsyncpa [#allocation6], 1 }
 0x48d   :  { %2659 = vsyncpa [#allocation9], 1 }
 0x48e   :  { %2660 = vsyncpa [#allocation12], 1 }
 0x48f   :  { %2661 = vsyncpa [#allocation4], 1 }

</bundles_post_ra>
